<compile_context>
chip_gen: v7x
topology: tpu7x:2x2x1
jax: 0.10.0
libtpu: 0.0.40
codegen_flags: <defaults>
</compile_context>

<pallas_src>
import jax
import jax.numpy as jnp
from jax import lax
from jax.experimental import pallas as pl
from jax.experimental.pallas import tpu as pltpu

MASK_BIAS = 1e30
BN_EPS = 1e-5
LRELU_SLOPE = 0.01
LANE = 128

# Row layout of the per-layer "vecs" slab (linear biases, BN affine params,
# cross-attention row bias).  Kept f32: it is ~12 KB/layer (negligible) and the
# BN affine / bias adds stay exact.
R_BQ_S, R_BK_S, R_BV_S = 0, 1, 2
R_B1, R_B2F, R_B2P = 3, 4, 5
R_BQP_S, R_BQP_C, R_RCROSS = 6, 7, 8
R_G_SELF, R_B_SELF = 9, 10
R_G_CROSS, R_B_CROSS = 11, 12
R_G_MLP1, R_B_MLP1 = 13, 14
R_G_OUT, R_B_OUT = 15, 16
NV_ROWS = 24  # padded to a sublane-friendly row count


def _round_up(x, m):
    return ((x + m - 1) // m) * m


def _pad2(x, rows, cols):
    """Zero-pad a 2-D array to [rows, cols] (f32)."""
    out = jnp.zeros((rows, cols), jnp.float32)
    return out.at[:x.shape[0], :x.shape[1]].set(x.astype(jnp.float32))


def _bn(x, gamma, beta, inv_n):
    """BatchNorm over nodes (dim 0), batch statistics, single-pass sum/sumsq."""
    s = jnp.sum(x, axis=0, keepdims=True)
    ss = jnp.sum(x * x, axis=0, keepdims=True)
    mean = s * inv_n
    var = jnp.maximum(ss * inv_n - mean * mean, 0.0)
    scale = gamma * lax.rsqrt(var + BN_EPS)
    return (x - mean) * scale + beta


def _make_kernel(radius, inv_n_obj, CP, P, Ne):
    def kernel(obj0_ref, pos0_ref, bself_ref, bcross_ref, rvs_ref, rvc_ref,
               w_ref, sc_ref, vc_ref, vecs_ref,
               out_obj_ref, out_pos_ref,
               obj_s, pos_s):
        layer = pl.program_id(0)

        @pl.when(layer == 0)
        def _():
            obj_s[...] = obj0_ref[...]
            pos_s[...] = pos0_ref[...]

        obj = obj_s[...]          # (No, CP)   carried object features
        pos = pos_s[...]          # (No, 128)  carried positions, lanes 0..P-1
        vecs = vecs_ref[...]      # (NV, CP)   bias / BN rows
        dn = (((1,), (1,)), ((), ()))   # contract last axes, no transposes

        def row(r):
            return vecs[r:r + 1]

        # ---------------- self attention --------------------------------
        # Single fused MXU pass: [q | k | v | qp] = obj @ [Wq|Wk|Wv|Wqp].
        # 1/sqrt(C) is folded into Wq (and hence into Wqp = Wq @ Wp).
        sqkv = jnp.dot(obj, w_ref[:, :4 * CP].astype(jnp.float32),
                       preferred_element_type=jnp.float32)
        q = sqkv[:, 0 * CP:1 * CP] + row(R_BQ_S)
        k = sqkv[:, 1 * CP:2 * CP] + row(R_BK_S)
        v = sqkv[:, 2 * CP:3 * CP] + row(R_BV_S)
        qp = sqkv[:, 3 * CP:4 * CP] + row(R_BQP_S)   # rel-pos query, lanes 0..P-1

        # score_ij = q_i.k_j + qp_i.pos_j - qp_i.pos_i + mask_bias
        score = (lax.dot_general(q, k, dn, preferred_element_type=jnp.float32)
                 + lax.dot_general(qp, pos, dn,
                                   preferred_element_type=jnp.float32)
                 - jnp.sum(qp * pos, axis=-1, keepdims=True)
                 + bself_ref[...])
        m = jnp.max(score, axis=-1, keepdims=True)
        e = jnp.exp(score - m)
        p_self = e * pl.reciprocal(jnp.sum(e, axis=-1, keepdims=True),
                                   approx=True)
        a_self = (jnp.dot(p_self, v, preferred_element_type=jnp.float32)
                  * rvs_ref[...])
        obj_self = _bn(obj + a_self, row(R_G_SELF), row(R_B_SELF), inv_n_obj)

        # ---------------- cross attention -------------------------------
        # Keys/values and the enc-side rel-pos bias were folded into sc/vc in
        # the wrapper (encoding never changes across layers), so the whole
        # score is ONE matmul:  raw = obj_self @ [Wq.K^T + Wqp.enc_pos^T | Wqp]
        raw = jnp.dot(obj_self, sc_ref[...].astype(jnp.float32),
                      preferred_element_type=jnp.float32)        # (No, Ne+P)
        qp_c = raw[:, Ne:Ne + P] + vecs[R_BQP_C:R_BQP_C + 1, :P]
        score_c = (raw[:, :Ne] + vecs[R_RCROSS:R_RCROSS + 1, :Ne]
                   + bcross_ref[...]
                   - jnp.sum(qp_c * pos[:, :P], axis=-1, keepdims=True))
        m_c = jnp.max(score_c, axis=-1, keepdims=True)
        e_c = jnp.exp(score_c - m_c)
        p_cross = e_c * pl.reciprocal(jnp.sum(e_c, axis=-1, keepdims=True),
                                      approx=True)
        a_cross = (jnp.dot(p_cross, vc_ref[...].astype(jnp.float32),
                           preferred_element_type=jnp.float32)
                   * rvc_ref[...])
        obj_cross = _bn(obj_self + a_cross, row(R_G_CROSS), row(R_B_CROSS),
                        inv_n_obj)

        # ---------------- MLP: Linear -> BN -> LeakyReLU -> Linear -------
        h = jnp.dot(obj_cross, w_ref[:, 4 * CP:5 * CP].astype(jnp.float32),
                    preferred_element_type=jnp.float32) + row(R_B1)
        h = _bn(h, row(R_G_MLP1), row(R_B_MLP1), inv_n_obj)
        h = jnp.maximum(h, LRELU_SLOPE * h)          # leaky relu

        fp = jnp.dot(h, w_ref[:, 5 * CP:7 * CP].astype(jnp.float32),
                     preferred_element_type=jnp.float32)   # [feat | dpos]
        feat = fp[:, :CP] + row(R_B2F)
        dpos = fp[:, CP:2 * CP] + row(R_B2P)                 # lanes 0..P-1 only

        new_obj = _bn(obj_cross + feat, row(R_G_OUT), row(R_B_OUT), inv_n_obj)
        new_pos = pos + dpos * radius

        obj_s[...] = new_obj
        pos_s[...] = new_pos

        @pl.when(layer == pl.num_programs(0) - 1)
        def _():
            out_obj_ref[...] = new_obj.astype(out_obj_ref.dtype)
            out_pos_ref[...] = new_pos.astype(out_pos_ref.dtype)

    return kernel


def _decoder_forward(obj_p, pos_p, bias_self, bias_cross, rv_self, rv_cross,
                     w_all, sc, vc, vecs, *, n_layers, radius, pos_dim):
    No, CP = obj_p.shape
    PP = pos_p.shape[1]
    Ne = vc.shape[1]
    P = pos_dim
    L = n_layers
    kernel = _make_kernel(radius, 1.0 / No, CP, P, Ne)

    def resident(shape):
        nd = len(shape)
        return pl.BlockSpec(tuple(shape), lambda l, _n=nd: (0,) * _n)

    def per_layer(shape):
        nd = len(shape)
        return pl.BlockSpec((None,) + tuple(shape),
                            lambda l, _n=nd: (l,) + (0,) * _n)

    in_specs = [
        resident((No, CP)), resident((No, PP)),      # initial object, pos
        resident((No, No)), resident((No, Ne)),      # additive mask biases
        resident((No, 1)), resident((No, 1)),        # row-valid vectors
        per_layer((CP, 7 * CP)),                     # fused weight slab (bf16)
        per_layer((CP, Ne + P)),                     # cross score mat + Wqp_c (bf16)
        per_layer((Ne, CP)),                         # precomputed cross V (bf16)
        per_layer((NV_ROWS, CP)),                    # bias / BN rows (f32)
    ]
    out_specs = (resident((No, CP)), resident((No, PP)))
    inputs = (obj_p, pos_p, bias_self, bias_cross, rv_self, rv_cross,
              w_all, sc, vc, vecs)

    # Advisory cost estimate for the XLA scheduler.
    flops = int(2 * L * No * CP * (7 * CP + (Ne + P) + 3 * No + 2 * Ne))
    transcendentals = int(L * No * (No + Ne))
    bytes_accessed = int(sum(int(x.size) * x.dtype.itemsize for x in inputs)
                         + (No * CP + No * PP) * 4)

    return pl.pallas_call(
        kernel,
        out_shape=(jax.ShapeDtypeStruct((No, CP), jnp.float32),
                   jax.ShapeDtypeStruct((No, PP), jnp.float32)),
        grid_spec=pltpu.PrefetchScalarGridSpec(
            num_scalar_prefetch=0,
            grid=(L,),
            in_specs=in_specs,
            out_specs=out_specs,
            scratch_shapes=[pltpu.VMEM((No, CP), jnp.float32),
                            pltpu.VMEM((No, PP), jnp.float32)]),
        compiler_params=pltpu.CompilerParams(
            dimension_semantics=("arbitrary",),       # layers are sequential
            vmem_limit_bytes=16 * 1024 * 1024),       # footprint is ~0.5 MiB
        cost_estimate=pl.CostEstimate(flops=flops,
                                      transcendentals=transcendentals,
                                      bytes_accessed=bytes_accessed),
    )(*inputs)


def _init_params(key, L, C, P, CP):
    """Deterministic synthetic parameters, packed for the fused kernel.

    All padded lanes/rows are exactly zero so the padded-channel invariance
    (channels C..CP-1 and pos lanes P..127 stay zero) holds end to end.
    """
    inv_sqrt_c = 1.0 / float(C) ** 0.5

    def rw(k, r, c, scale=0.1):
        return jax.random.normal(k, (r, c), jnp.float32) * scale

    w_all_layers, vecs_layers = [], []
    wq_c_l, wk_c_l, bk_c_l, wv_c_l, bv_c_l = [], [], [], [], []
    wqp_c_l, bq_c_l, bqp_c_l = [], [], []

    for lk in jax.random.split(key, L):
        ks = jax.random.split(lk, 11)
        # self attention (1/sqrt(C) folded into Wq -> also into Wqp = Wq @ Wp)
        s_wq = rw(ks[0], C, C) * inv_sqrt_c
        s_wk, s_wv, s_wp = rw(ks[1], C, C), rw(ks[2], C, C), rw(ks[3], C, P)
        # cross attention
        c_wq = rw(ks[4], C, C) * inv_sqrt_c
        c_wk, c_wv, c_wp = rw(ks[5], C, C), rw(ks[6], C, C), rw(ks[7], C, P)
        # MLP
        w1, w2f, w2p = rw(ks[8], C, C), rw(ks[9], C, C), rw(ks[10], C, P)

        s_wqp = s_wq @ s_wp          # (C, P)
        c_wqp = c_wq @ c_wp          # (C, P)

        # Fused per-layer weight slab: [Wq_s|Wk_s|Wv_s|Wqp_s|W1|W2f|W2p]
        slab = jnp.zeros((CP, 7 * CP), jnp.float32)

        def put(s, w, col0):
            return s.at[:w.shape[0], col0:col0 + w.shape[1]].set(w)

        slab = put(slab, s_wq, 0 * CP)
        slab = put(slab, s_wk, 1 * CP)
        slab = put(slab, s_wv, 2 * CP)
        slab = put(slab, s_wqp, 3 * CP)   # only lanes 3*CP .. 3*CP+P-1 nonzero
        slab = put(slab, w1, 4 * CP)
        slab = put(slab, w2f, 5 * CP)
        slab = put(slab, w2p, 6 * CP)     # only lanes 6*CP .. 6*CP+P-1 nonzero
        w_all_layers.append(slab)

        # Bias / BN rows.  All linear biases are zero in this synthetic init;
        # the plumbing (rows / cross row bias) is kept for generality.
        vecs = jnp.zeros((NV_ROWS, CP), jnp.float32)
        ones_c = jnp.zeros((CP,), jnp.float32).at[:C].set(1.0)
        for grow in (R_G_SELF, R_G_CROSS, R_G_MLP1, R_G_OUT):
            vecs = vecs.at[grow].set(ones_c)
        vecs_layers.append(vecs)

        # Raw (true-shape, f32) cross weights kept for the wrapper-side
        # layer-invariant K/V + score-matrix precompute.
        wq_c_l.append(c_wq)
        wk_c_l.append(c_wk)
        wv_c_l.append(c_wv)
        bk_c_l.append(jnp.zeros((1, C), jnp.float32))
        bv_c_l.append(jnp.zeros((1, C), jnp.float32))
        wqp_c_l.append(c_wqp)
        bq_c_l.append(jnp.zeros((C,), jnp.float32))
        bqp_c_l.append(jnp.zeros((P,), jnp.float32))

    return dict(
        w_all=jnp.stack(w_all_layers).astype(jnp.bfloat16),   # (L, CP, 7*CP)
        vecs_base=jnp.stack(vecs_layers),                      # (L, NV, CP) f32
        wq_c=jnp.stack(wq_c_l), wk_c=jnp.stack(wk_c_l), wv_c=jnp.stack(wv_c_l),
        bk_c=jnp.stack(bk_c_l), bv_c=jnp.stack(bv_c_l),
        wqp_c=jnp.stack(wqp_c_l),
        bq_c=jnp.stack(bq_c_l), bqp_c=jnp.stack(bqp_c_l),
    )


class SpatialTransformerDecoderPallas:
    def __init__(self, n_channels, n_layers, pos_dim, heads=1, dropout=0.0,
                 radius=1.0, key=None):
        assert heads == 1, "kernel implemented for heads=1"
        assert dropout == 0.0, "dropout is a no-op in this kernel"
        assert pos_dim <= LANE
        self.n_channels = n_channels
        self.n_layers = n_layers
        self.pos_dim = pos_dim
        self.radius = float(radius)
        self.cp = _round_up(max(n_channels, LANE), LANE)   # lane-dense features
        self.pp = LANE                                     # lane-dense pos state
        key = jax.random.PRNGKey(42) if key is None else key
        self.params = _init_params(key, n_layers, n_channels, pos_dim, self.cp)

    def __call__(self, encoding, encoding_pos, object_feat, object_pos,
                 edge_index_object, edge_index_cross):
        C, P, CP, PP = self.n_channels, self.pos_dim, self.cp, self.pp
        No = object_feat.shape[0]
        Ne = encoding.shape[0]
        assert Ne <= CP, "cross row-bias packing assumes Ne <= padded channels"
        p = self.params

        # Densify edge lists -> additive softmax bias (0 edge / -1e30 no edge)
        # plus a per-destination validity vector for isolated nodes.
        mask_self = jnp.zeros((No, No), jnp.float32).at[
            edge_index_object[1], edge_index_object[0]].set(1.0)
        mask_cross = jnp.zeros((No, Ne), jnp.float32).at[
            edge_index_cross[1], edge_index_cross[0]].set(1.0)
        bias_self = (mask_self - 1.0) * MASK_BIAS
        bias_cross = (mask_cross - 1.0) * MASK_BIAS
        rv_self = (jnp.sum(mask_self, -1, keepdims=True) > 0.0
                   ).astype(jnp.float32)
        rv_cross = (jnp.sum(mask_cross, -1, keepdims=True) > 0.0
                    ).astype(jnp.float32)

        obj_p = _pad2(object_feat, No, CP)
        pos_p = _pad2(object_pos, No, PP)
        enc = encoding.astype(jnp.float32)
        enc_pos = encoding_pos.astype(jnp.float32)

        # Layer-invariant cross-attention precompute (the encoding never
        # changes across layers): K/V projections and the full enc-side score
        # matrix M = Wq.K^T + Wqp.enc_pos^T  (with its row bias r).
        kc = jnp.einsum('nc,lcd->lnd', enc, p['wk_c']) + p['bk_c']     # (L,Ne,C)
        vc = jnp.einsum('nc,lcd->lnd', enc, p['wv_c']) + p['bv_c']     # (L,Ne,C)
        m = (jnp.einsum('lcd,lnd->lcn', p['wq_c'], kc)
             + jnp.einsum('lcp,np->lcn', p['wqp_c'], enc_pos))          # (L,C,Ne)
        r = (jnp.einsum('lc,lnc->ln', p['bq_c'], kc)
             + jnp.einsum('lp,np->ln', p['bqp_c'], enc_pos))            # (L,Ne)
        sc = jnp.concatenate([m, p['wqp_c']], axis=-1)                  # (L,C,Ne+P)
        sc = jnp.pad(sc, ((0, 0), (0, CP - C), (0, 0))).astype(jnp.bfloat16)
        vc = jnp.pad(vc, ((0, 0), (0, 0), (0, CP - C))).astype(jnp.bfloat16)

        vecs = p['vecs_base']
        vecs = vecs.at[:, R_BQP_C, :P].set(p['bqp_c'])
        vecs = vecs.at[:, R_RCROSS, :Ne].set(r)

        out_obj, out_pos = _decoder_forward(
            obj_p, pos_p, bias_self, bias_cross, rv_self, rv_cross,
            p['w_all'], sc, vc, vecs,
            n_layers=self.n_layers, radius=self.radius, pos_dim=P)
        return out_obj[:, :C], out_pos[:, :P]


if __name__ == "__main__":
    # small shapes consistent with the module's forward signature
    C, P, n_layers, heads = 32, 2, 2, 1
    Ne, No = 16, 8           # encoding nodes, object nodes
    E_obj, E_cross = 24, 32  # edge counts

    key = jax.random.PRNGKey(0)
    ks = jax.random.split(key, 8)
    encoding = jax.random.normal(ks[0], (Ne, C), jnp.float32)
    encoding_pos = jax.random.normal(ks[1], (Ne, P), jnp.float32)
    object_feat = jax.random.normal(ks[2], (No, C), jnp.float32)
    object_pos = jax.random.normal(ks[3], (No, P), jnp.float32)
    edge_index_object = jnp.stack([
        jax.random.randint(ks[4], (E_obj,), 0, No),
        jax.random.randint(ks[5], (E_obj,), 0, No)]).astype(jnp.int32)
    edge_index_cross = jnp.stack([
        jax.random.randint(ks[6], (E_cross,), 0, Ne),
        jax.random.randint(ks[7], (E_cross,), 0, No)]).astype(jnp.int32)

    model = SpatialTransformerDecoderPallas(
        n_channels=C, n_layers=n_layers, pos_dim=P, heads=heads, radius=1.0,
        key=jax.random.PRNGKey(42))

    out_obj, out_pos = model(encoding, encoding_pos, object_feat, object_pos,
                             edge_index_object, edge_index_cross)
    jax.block_until_ready((out_obj, out_pos))

    assert out_obj.shape == (No, C) and out_obj.dtype == jnp.float32
    assert out_pos.shape == (No, P) and out_pos.dtype == jnp.float32
    assert bool(jnp.all(jnp.isfinite(out_obj)))
    assert bool(jnp.all(jnp.isfinite(out_pos)))
    print("KERNEL_OK")
</pallas_src>

<mosaic_0001>
module attributes {stable_mosaic.version = 11 : i64} {
  func.func @kernel(%arg0: i32, %arg1: memref<8x128xf32, #tpu.memory_space<vmem>>, %arg2: memref<8x128xf32, #tpu.memory_space<vmem>>, %arg3: memref<8x8xf32, #tpu.memory_space<vmem>>, %arg4: memref<8x16xf32, #tpu.memory_space<vmem>>, %arg5: memref<8x1xf32, #tpu.memory_space<vmem>>, %arg6: memref<8x1xf32, #tpu.memory_space<vmem>>, %arg7: memref<1x128x896xbf16, #tpu.memory_space<vmem>>, %arg8: memref<1x128x18xbf16, #tpu.memory_space<vmem>>, %arg9: memref<1x16x128xbf16, #tpu.memory_space<vmem>>, %arg10: memref<1x24x128xf32, #tpu.memory_space<vmem>>, %arg11: memref<8x128xf32, #tpu.memory_space<vmem>>, %arg12: memref<8x128xf32, #tpu.memory_space<vmem>>, %arg13: memref<8x128xf32, #tpu.memory_space<vmem>>, %arg14: memref<8x128xf32, #tpu.memory_space<vmem>>) attributes {dimension_semantics = [#tpu.dimension_semantics<arbitrary>], iteration_bounds = array<i64: 2>, scalar_prefetch = 0 : i64, scratch_operands = 2 : i64, tpu.core_type = #tpu.core_type<tc>, window_params = [{pipeline_mode = #tpu.pipeline_mode<synchronous>, transform_indices = @transform_0, window_bounds = array<i64: 8, 128>}, {pipeline_mode = #tpu.pipeline_mode<synchronous>, transform_indices = @transform_1, window_bounds = array<i64: 8, 128>}, {pipeline_mode = #tpu.pipeline_mode<synchronous>, transform_indices = @transform_2, window_bounds = array<i64: 8, 8>}, {pipeline_mode = #tpu.pipeline_mode<synchronous>, transform_indices = @transform_3, window_bounds = array<i64: 8, 16>}, {pipeline_mode = #tpu.pipeline_mode<synchronous>, transform_indices = @transform_4, window_bounds = array<i64: 8, 1>}, {pipeline_mode = #tpu.pipeline_mode<synchronous>, transform_indices = @transform_5, window_bounds = array<i64: 8, 1>}, {transform_indices = @transform_6, window_bounds = array<i64: 1, 128, 896>}, {transform_indices = @transform_7, window_bounds = array<i64: 1, 128, 18>}, {transform_indices = @transform_8, window_bounds = array<i64: 1, 16, 128>}, {transform_indices = @transform_9, window_bounds = array<i64: 1, 24, 128>}, {pipeline_mode = #tpu.pipeline_mode<synchronous>, transform_indices = @transform_10, window_bounds = array<i64: 8, 128>}, {pipeline_mode = #tpu.pipeline_mode<synchronous>, transform_indices = @transform_11, window_bounds = array<i64: 8, 128>}]} {
    %c0_i32 = arith.constant 0 : i32
    %0 = arith.cmpi eq, %arg0, %c0_i32 : i32
    %1 = arith.extui %0 : i1 to i32
    %c0_i32_0 = arith.constant 0 : i32
    %2 = arith.cmpi ne, %1, %c0_i32_0 : i32
    scf.if %2 {
      %c0_72 = arith.constant 0 : index
      %c0_73 = arith.constant 0 : index
      %221 = vector.load %arg1[%c0_72, %c0_73] : memref<8x128xf32, #tpu.memory_space<vmem>>, vector<8x128xf32>
      %c0_74 = arith.constant 0 : index
      %c0_75 = arith.constant 0 : index
      %222 = vector.load %arg13[%c0_74, %c0_75] : memref<8x128xf32, #tpu.memory_space<vmem>>, vector<8x128xf32>
      tpu.vector_store %arg13[%c0_74, %c0_75], %221 {strides = array<i32>} : memref<8x128xf32, #tpu.memory_space<vmem>>, vector<8x128xf32>,
      %c0_76 = arith.constant 0 : index
      %c0_77 = arith.constant 0 : index
      %223 = vector.load %arg2[%c0_76, %c0_77] : memref<8x128xf32, #tpu.memory_space<vmem>>, vector<8x128xf32>
      %c0_78 = arith.constant 0 : index
      %c0_79 = arith.constant 0 : index
      %224 = vector.load %arg14[%c0_78, %c0_79] : memref<8x128xf32, #tpu.memory_space<vmem>>, vector<8x128xf32>
      tpu.vector_store %arg14[%c0_78, %c0_79], %223 {strides = array<i32>} : memref<8x128xf32, #tpu.memory_space<vmem>>, vector<8x128xf32>,
    } else {
    }
    %c0 = arith.constant 0 : index
    %c0_1 = arith.constant 0 : index
    %3 = vector.load %arg13[%c0, %c0_1] : memref<8x128xf32, #tpu.memory_space<vmem>>, vector<8x128xf32>
    %c0_2 = arith.constant 0 : index
    %c0_3 = arith.constant 0 : index
    %4 = vector.load %arg14[%c0_2, %c0_3] : memref<8x128xf32, #tpu.memory_space<vmem>>, vector<8x128xf32>
    %c0_4 = arith.constant 0 : index
    %c0_5 = arith.constant 0 : index
    %c0_6 = arith.constant 0 : index
    %5 = vector.load %arg10[%c0_4, %c0_5, %c0_6] : memref<1x24x128xf32, #tpu.memory_space<vmem>>, vector<1x24x128xf32>
    %6 = vector.shape_cast %5 : vector<1x24x128xf32> to vector<24x128xf32>
    %c0_7 = arith.constant 0 : index
    %c0_8 = arith.constant 0 : index
    %c0_9 = arith.constant 0 : index
    %7 = vector.load %arg7[%c0_7, %c0_8, %c0_9] : memref<1x128x896xbf16, #tpu.memory_space<vmem>>, vector<1x128x512xbf16>
    %8 = vector.shape_cast %7 : vector<1x128x512xbf16> to vector<128x512xbf16>
    %9 = arith.extf %8 : vector<128x512xbf16> to vector<128x512xf32>
    %cst = arith.constant dense<0.000000e+00> : vector<8x512xf32>
    %10 = tpu.matmul %3, %9, %cst {dimension_numbers = #tpu.dot_dimension_numbers<[1], [0], [0], [1], [0, 0, 1, 1], [], []>} : vector<8x128xf32>, vector<128x512xf32>, vector<8x512xf32> -> vector<8x512xf32>
    %11 = vector.extract_strided_slice %10 {offsets = [0, 0], sizes = [8, 128], strides = [1, 1]} : vector<8x512xf32> to vector<8x128xf32>
    %12 = vector.extract_strided_slice %6 {offsets = [0, 0], sizes = [1, 128], strides = [1, 1]} : vector<24x128xf32> to vector<1x128xf32>
    %13 = vector.broadcast %12 : vector<1x128xf32> to vector<8x128xf32>
    %14 = arith.addf %11, %13 : vector<8x128xf32>
    %15 = vector.extract_strided_slice %10 {offsets = [0, 128], sizes = [8, 128], strides = [1, 1]} : vector<8x512xf32> to vector<8x128xf32>
    %16 = vector.extract_strided_slice %6 {offsets = [1, 0], sizes = [1, 128], strides = [1, 1]} : vector<24x128xf32> to vector<1x128xf32>
    %17 = vector.broadcast %16 : vector<1x128xf32> to vector<8x128xf32>
    %18 = arith.addf %15, %17 : vector<8x128xf32>
    %19 = vector.extract_strided_slice %10 {offsets = [0, 256], sizes = [8, 128], strides = [1, 1]} : vector<8x512xf32> to vector<8x128xf32>
    %20 = vector.extract_strided_slice %6 {offsets = [2, 0], sizes = [1, 128], strides = [1, 1]} : vector<24x128xf32> to vector<1x128xf32>
    %21 = vector.broadcast %20 : vector<1x128xf32> to vector<8x128xf32>
    %22 = arith.addf %19, %21 : vector<8x128xf32>
    %23 = vector.extract_strided_slice %10 {offsets = [0, 384], sizes = [8, 128], strides = [1, 1]} : vector<8x512xf32> to vector<8x128xf32>
    %24 = vector.extract_strided_slice %6 {offsets = [6, 0], sizes = [1, 128], strides = [1, 1]} : vector<24x128xf32> to vector<1x128xf32>
    %25 = vector.broadcast %24 : vector<1x128xf32> to vector<8x128xf32>
    %26 = arith.addf %23, %25 : vector<8x128xf32>
    %cst_10 = arith.constant dense<0.000000e+00> : vector<8x8xf32>
    %27 = tpu.matmul %14, %18, %cst_10 {dimension_numbers = #tpu.dot_dimension_numbers<[1], [1], [0], [0], [0, 0, 1, 0], [], []>} : vector<8x128xf32>, vector<8x128xf32>, vector<8x8xf32> -> vector<8x8xf32>
    %cst_11 = arith.constant dense<0.000000e+00> : vector<8x8xf32>
    %28 = tpu.matmul %26, %4, %cst_11 {dimension_numbers = #tpu.dot_dimension_numbers<[1], [1], [0], [0], [0, 0, 1, 0], [], []>} : vector<8x128xf32>, vector<8x128xf32>, vector<8x8xf32> -> vector<8x8xf32>
    %29 = arith.addf %27, %28 : vector<8x8xf32>
    %30 = arith.mulf %26, %4 : vector<8x128xf32>
    %cst_12 = arith.constant dense<0.000000e+00> : vector<8xf32>
    %31 = vector.multi_reduction <add>, %30, %cst_12 [1] : vector<8x128xf32> to vector<8xf32>
    %32 = vector.shape_cast %31 : vector<8xf32> to vector<8x1xf32>
    %33 = vector.broadcast %32 : vector<8x1xf32> to vector<8x8xf32>
    %34 = arith.subf %29, %33 : vector<8x8xf32>
    %c0_13 = arith.constant 0 : index
    %c0_14 = arith.constant 0 : index
    %35 = vector.load %arg3[%c0_13, %c0_14] : memref<8x8xf32, #tpu.memory_space<vmem>>, vector<8x8xf32>
    %36 = arith.addf %34, %35 : vector<8x8xf32>
    %cst_15 = arith.constant dense<0xFF800000> : vector<8xf32>
    %37 = vector.multi_reduction <maximumf>, %36, %cst_15 [1] : vector<8x8xf32> to vector<8xf32>
    %38 = vector.shape_cast %37 : vector<8xf32> to vector<8x1xf32>
    %39 = vector.broadcast %38 : vector<8x1xf32> to vector<8x8xf32>
    %40 = arith.subf %36, %39 : vector<8x8xf32>
    %41 = math.exp %40 : vector<8x8xf32>
    %cst_16 = arith.constant dense<0.000000e+00> : vector<8xf32>
    %42 = vector.multi_reduction <add>, %41, %cst_16 [1] : vector<8x8xf32> to vector<8xf32>
    %43 = vector.shape_cast %42 : vector<8xf32> to vector<8x1xf32>
    %44 = tpu.reciprocal %43 {approx = true} : vector<8x1xf32> -> vector<8x1xf32>
    %45 = vector.broadcast %44 : vector<8x1xf32> to vector<8x8xf32>
    %46 = arith.mulf %41, %45 : vector<8x8xf32>
    %cst_17 = arith.constant dense<0.000000e+00> : vector<8x128xf32>
    %47 = tpu.matmul %46, %22, %cst_17 {dimension_numbers = #tpu.dot_dimension_numbers<[1], [0], [0], [1], [0, 0, 1, 1], [], []>} : vector<8x8xf32>, vector<8x128xf32>, vector<8x128xf32> -> vector<8x128xf32>
    %c0_18 = arith.constant 0 : index
    %c0_19 = arith.constant 0 : index
    %48 = vector.load %arg5[%c0_18, %c0_19] : memref<8x1xf32, #tpu.memory_space<vmem>>, vector<8x1xf32>
    %49 = vector.broadcast %48 : vector<8x1xf32> to vector<8x128xf32>
    %50 = arith.mulf %47, %49 : vector<8x128xf32>
    %51 = arith.addf %3, %50 : vector<8x128xf32>
    %52 = vector.extract_strided_slice %6 {offsets = [9, 0], sizes = [1, 128], strides = [1, 1]} : vector<24x128xf32> to vector<1x128xf32>
    %53 = vector.extract_strided_slice %6 {offsets = [10, 0], sizes = [1, 128], strides = [1, 1]} : vector<24x128xf32> to vector<1x128xf32>
    %cst_20 = arith.constant dense<0.000000e+00> : vector<128xf32>
    %54 = vector.multi_reduction <add>, %51, %cst_20 [0] : vector<8x128xf32> to vector<128xf32>
    %55 = vector.shape_cast %54 : vector<128xf32> to vector<1x128xf32>
    %56 = arith.mulf %51, %51 : vector<8x128xf32>
    %cst_21 = arith.constant dense<0.000000e+00> : vector<128xf32>
    %57 = vector.multi_reduction <add>, %56, %cst_21 [0] : vector<8x128xf32> to vector<128xf32>
    %58 = vector.shape_cast %57 : vector<128xf32> to vector<1x128xf32>
    %cst_22 = arith.constant 1.250000e-01 : f32
    %59 = vector.broadcast %cst_22 : f32 to vector<1x128xf32>
    %60 = arith.mulf %55, %59 : vector<1x128xf32>
    %cst_23 = arith.constant 1.250000e-01 : f32
    %61 = vector.broadcast %cst_23 : f32 to vector<1x128xf32>
    %62 = arith.mulf %58, %61 : vector<1x128xf32>
    %63 = arith.mulf %60, %60 : vector<1x128xf32>
    %64 = arith.subf %62, %63 : vector<1x128xf32>
    %cst_24 = arith.constant 0.000000e+00 : f32
    %65 = vector.broadcast %cst_24 : f32 to vector<1x128xf32>
    %66 = arith.maximumf %64, %65 : vector<1x128xf32>
    %cst_25 = arith.constant 9.99999974E-6 : f32
    %67 = vector.broadcast %cst_25 : f32 to vector<1x128xf32>
    %68 = arith.addf %66, %67 : vector<1x128xf32>
    %69 = math.rsqrt %68 : vector<1x128xf32>
    %70 = arith.mulf %52, %69 : vector<1x128xf32>
    %71 = vector.broadcast %60 : vector<1x128xf32> to vector<8x128xf32>
    %72 = arith.subf %51, %71 : vector<8x128xf32>
    %73 = vector.broadcast %70 : vector<1x128xf32> to vector<8x128xf32>
    %74 = arith.mulf %72, %73 : vector<8x128xf32>
    %75 = vector.broadcast %53 : vector<1x128xf32> to vector<8x128xf32>
    %76 = arith.addf %74, %75 : vector<8x128xf32>
    %c0_26 = arith.constant 0 : index
    %c0_27 = arith.constant 0 : index
    %c0_28 = arith.constant 0 : index
    %77 = vector.load %arg8[%c0_26, %c0_27, %c0_28] : memref<1x128x18xbf16, #tpu.memory_space<vmem>>, vector<1x128x18xbf16>
    %78 = vector.shape_cast %77 : vector<1x128x18xbf16> to vector<128x18xbf16>
    %79 = arith.extf %78 : vector<128x18xbf16> to vector<128x18xf32>
    %cst_29 = arith.constant dense<0.000000e+00> : vector<8x18xf32>
    %80 = tpu.matmul %76, %79, %cst_29 {dimension_numbers = #tpu.dot_dimension_numbers<[1], [0], [0], [1], [0, 0, 1, 1], [], []>} : vector<8x128xf32>, vector<128x18xf32>, vector<8x18xf32> -> vector<8x18xf32>
    %81 = vector.extract_strided_slice %80 {offsets = [0, 16], sizes = [8, 2], strides = [1, 1]} : vector<8x18xf32> to vector<8x2xf32>
    %82 = vector.extract_strided_slice %6 {offsets = [7, 0], sizes = [1, 2], strides = [1, 1]} : vector<24x128xf32> to vector<1x2xf32>
    %83 = vector.broadcast %82 : vector<1x2xf32> to vector<8x2xf32>
    %84 = arith.addf %81, %83 : vector<8x2xf32>
    %85 = vector.extract_strided_slice %80 {offsets = [0, 0], sizes = [8, 16], strides = [1, 1]} : vector<8x18xf32> to vector<8x16xf32>
    %86 = vector.extract_strided_slice %6 {offsets = [8, 0], sizes = [1, 16], strides = [1, 1]} : vector<24x128xf32> to vector<1x16xf32>
    %87 = vector.broadcast %86 : vector<1x16xf32> to vector<8x16xf32>
    %88 = arith.addf %85, %87 : vector<8x16xf32>
    %c0_30 = arith.constant 0 : index
    %c0_31 = arith.constant 0 : index
    %89 = vector.load %arg4[%c0_30, %c0_31] : memref<8x16xf32, #tpu.memory_space<vmem>>, vector<8x16xf32>
    %90 = arith.addf %88, %89 : vector<8x16xf32>
    %91 = vector.extract_strided_slice %4 {offsets = [0, 0], sizes = [8, 2], strides = [1, 1]} : vector<8x128xf32> to vector<8x2xf32>
    %92 = arith.mulf %84, %91 : vector<8x2xf32>
    %cst_32 = arith.constant dense<0.000000e+00> : vector<8xf32>
    %93 = vector.multi_reduction <add>, %92, %cst_32 [1] : vector<8x2xf32> to vector<8xf32>
    %94 = vector.shape_cast %93 : vector<8xf32> to vector<8x1xf32>
    %95 = vector.broadcast %94 : vector<8x1xf32> to vector<8x16xf32>
    %96 = arith.subf %90, %95 : vector<8x16xf32>
    %cst_33 = arith.constant dense<0xFF800000> : vector<8xf32>
    %97 = vector.multi_reduction <maximumf>, %96, %cst_33 [1] : vector<8x16xf32> to vector<8xf32>
    %98 = vector.shape_cast %97 : vector<8xf32> to vector<8x1xf32>
    %99 = vector.broadcast %98 : vector<8x1xf32> to vector<8x16xf32>
    %100 = arith.subf %96, %99 : vector<8x16xf32>
    %101 = math.exp %100 : vector<8x16xf32>
    %cst_34 = arith.constant dense<0.000000e+00> : vector<8xf32>
    %102 = vector.multi_reduction <add>, %101, %cst_34 [1] : vector<8x16xf32> to vector<8xf32>
    %103 = vector.shape_cast %102 : vector<8xf32> to vector<8x1xf32>
    %104 = tpu.reciprocal %103 {approx = true} : vector<8x1xf32> -> vector<8x1xf32>
    %105 = vector.broadcast %104 : vector<8x1xf32> to vector<8x16xf32>
    %106 = arith.mulf %101, %105 : vector<8x16xf32>
    %c0_35 = arith.constant 0 : index
    %c0_36 = arith.constant 0 : index
    %c0_37 = arith.constant 0 : index
    %107 = vector.load %arg9[%c0_35, %c0_36, %c0_37] : memref<1x16x128xbf16, #tpu.memory_space<vmem>>, vector<1x16x128xbf16>
    %108 = vector.shape_cast %107 : vector<1x16x128xbf16> to vector<16x128xbf16>
    %109 = arith.extf %108 : vector<16x128xbf16> to vector<16x128xf32>
    %cst_38 = arith.constant dense<0.000000e+00> : vector<8x128xf32>
    %110 = tpu.matmul %106, %109, %cst_38 {dimension_numbers = #tpu.dot_dimension_numbers<[1], [0], [0], [1], [0, 0, 1, 1], [], []>} : vector<8x16xf32>, vector<16x128xf32>, vector<8x128xf32> -> vector<8x128xf32>
    %c0_39 = arith.constant 0 : index
    %c0_40 = arith.constant 0 : index
    %111 = vector.load %arg6[%c0_39, %c0_40] : memref<8x1xf32, #tpu.memory_space<vmem>>, vector<8x1xf32>
    %112 = vector.broadcast %111 : vector<8x1xf32> to vector<8x128xf32>
    %113 = arith.mulf %110, %112 : vector<8x128xf32>
    %114 = arith.addf %76, %113 : vector<8x128xf32>
    %115 = vector.extract_strided_slice %6 {offsets = [11, 0], sizes = [1, 128], strides = [1, 1]} : vector<24x128xf32> to vector<1x128xf32>
    %116 = vector.extract_strided_slice %6 {offsets = [12, 0], sizes = [1, 128], strides = [1, 1]} : vector<24x128xf32> to vector<1x128xf32>
    %cst_41 = arith.constant dense<0.000000e+00> : vector<128xf32>
    %117 = vector.multi_reduction <add>, %114, %cst_41 [0] : vector<8x128xf32> to vector<128xf32>
    %118 = vector.shape_cast %117 : vector<128xf32> to vector<1x128xf32>
    %119 = arith.mulf %114, %114 : vector<8x128xf32>
    %cst_42 = arith.constant dense<0.000000e+00> : vector<128xf32>
    %120 = vector.multi_reduction <add>, %119, %cst_42 [0] : vector<8x128xf32> to vector<128xf32>
    %121 = vector.shape_cast %120 : vector<128xf32> to vector<1x128xf32>
    %cst_43 = arith.constant 1.250000e-01 : f32
    %122 = vector.broadcast %cst_43 : f32 to vector<1x128xf32>
    %123 = arith.mulf %118, %122 : vector<1x128xf32>
    %cst_44 = arith.constant 1.250000e-01 : f32
    %124 = vector.broadcast %cst_44 : f32 to vector<1x128xf32>
    %125 = arith.mulf %121, %124 : vector<1x128xf32>
    %126 = arith.mulf %123, %123 : vector<1x128xf32>
    %127 = arith.subf %125, %126 : vector<1x128xf32>
    %cst_45 = arith.constant 0.000000e+00 : f32
    %128 = vector.broadcast %cst_45 : f32 to vector<1x128xf32>
    %129 = arith.maximumf %127, %128 : vector<1x128xf32>
    %cst_46 = arith.constant 9.99999974E-6 : f32
    %130 = vector.broadcast %cst_46 : f32 to vector<1x128xf32>
    %131 = arith.addf %129, %130 : vector<1x128xf32>
    %132 = math.rsqrt %131 : vector<1x128xf32>
    %133 = arith.mulf %115, %132 : vector<1x128xf32>
    %134 = vector.broadcast %123 : vector<1x128xf32> to vector<8x128xf32>
    %135 = arith.subf %114, %134 : vector<8x128xf32>
    %136 = vector.broadcast %133 : vector<1x128xf32> to vector<8x128xf32>
    %137 = arith.mulf %135, %136 : vector<8x128xf32>
    %138 = vector.broadcast %116 : vector<1x128xf32> to vector<8x128xf32>
    %139 = arith.addf %137, %138 : vector<8x128xf32>
    %c0_47 = arith.constant 0 : index
    %c0_48 = arith.constant 0 : index
    %c512 = arith.constant 512 : index
    %140 = vector.load %arg7[%c0_47, %c0_48, %c512] : memref<1x128x896xbf16, #tpu.memory_space<vmem>>, vector<1x128x128xbf16>
    %141 = vector.shape_cast %140 : vector<1x128x128xbf16> to vector<128x128xbf16>
    %142 = arith.extf %141 : vector<128x128xbf16> to vector<128x128xf32>
    %cst_49 = arith.constant dense<0.000000e+00> : vector<8x128xf32>
    %143 = tpu.matmul %139, %142, %cst_49 {dimension_numbers = #tpu.dot_dimension_numbers<[1], [0], [0], [1], [0, 0, 1, 1], [], []>} : vector<8x128xf32>, vector<128x128xf32>, vector<8x128xf32> -> vector<8x128xf32>
    %144 = vector.extract_strided_slice %6 {offsets = [3, 0], sizes = [1, 128], strides = [1, 1]} : vector<24x128xf32> to vector<1x128xf32>
    %145 = vector.broadcast %144 : vector<1x128xf32> to vector<8x128xf32>
    %146 = arith.addf %143, %145 : vector<8x128xf32>
    %147 = vector.extract_strided_slice %6 {offsets = [13, 0], sizes = [1, 128], strides = [1, 1]} : vector<24x128xf32> to vector<1x128xf32>
    %148 = vector.extract_strided_slice %6 {offsets = [14, 0], sizes = [1, 128], strides = [1, 1]} : vector<24x128xf32> to vector<1x128xf32>
    %cst_50 = arith.constant dense<0.000000e+00> : vector<128xf32>
    %149 = vector.multi_reduction <add>, %146, %cst_50 [0] : vector<8x128xf32> to vector<128xf32>
    %150 = vector.shape_cast %149 : vector<128xf32> to vector<1x128xf32>
    %151 = arith.mulf %146, %146 : vector<8x128xf32>
    %cst_51 = arith.constant dense<0.000000e+00> : vector<128xf32>
    %152 = vector.multi_reduction <add>, %151, %cst_51 [0] : vector<8x128xf32> to vector<128xf32>
    %153 = vector.shape_cast %152 : vector<128xf32> to vector<1x128xf32>
    %cst_52 = arith.constant 1.250000e-01 : f32
    %154 = vector.broadcast %cst_52 : f32 to vector<1x128xf32>
    %155 = arith.mulf %150, %154 : vector<1x128xf32>
    %cst_53 = arith.constant 1.250000e-01 : f32
    %156 = vector.broadcast %cst_53 : f32 to vector<1x128xf32>
    %157 = arith.mulf %153, %156 : vector<1x128xf32>
    %158 = arith.mulf %155, %155 : vector<1x128xf32>
    %159 = arith.subf %157, %158 : vector<1x128xf32>
    %cst_54 = arith.constant 0.000000e+00 : f32
    %160 = vector.broadcast %cst_54 : f32 to vector<1x128xf32>
    %161 = arith.maximumf %159, %160 : vector<1x128xf32>
    %cst_55 = arith.constant 9.99999974E-6 : f32
    %162 = vector.broadcast %cst_55 : f32 to vector<1x128xf32>
    %163 = arith.addf %161, %162 : vector<1x128xf32>
    %164 = math.rsqrt %163 : vector<1x128xf32>
    %165 = arith.mulf %147, %164 : vector<1x128xf32>
    %166 = vector.broadcast %155 : vector<1x128xf32> to vector<8x128xf32>
    %167 = arith.subf %146, %166 : vector<8x128xf32>
    %168 = vector.broadcast %165 : vector<1x128xf32> to vector<8x128xf32>
    %169 = arith.mulf %167, %168 : vector<8x128xf32>
    %170 = vector.broadcast %148 : vector<1x128xf32> to vector<8x128xf32>
    %171 = arith.addf %169, %170 : vector<8x128xf32>
    %cst_56 = arith.constant 0.00999999977 : f32
    %172 = vector.broadcast %cst_56 : f32 to vector<8x128xf32>
    %173 = arith.mulf %172, %171 : vector<8x128xf32>
    %174 = arith.maximumf %171, %173 : vector<8x128xf32>
    %c0_57 = arith.constant 0 : index
    %c0_58 = arith.constant 0 : index
    %c640 = arith.constant 640 : index
    %175 = vector.load %arg7[%c0_57, %c0_58, %c640] : memref<1x128x896xbf16, #tpu.memory_space<vmem>>, vector<1x128x256xbf16>
    %176 = vector.shape_cast %175 : vector<1x128x256xbf16> to vector<128x256xbf16>
    %177 = arith.extf %176 : vector<128x256xbf16> to vector<128x256xf32>
    %cst_59 = arith.constant dense<0.000000e+00> : vector<8x256xf32>
    %178 = tpu.matmul %174, %177, %cst_59 {dimension_numbers = #tpu.dot_dimension_numbers<[1], [0], [0], [1], [0, 0, 1, 1], [], []>} : vector<8x128xf32>, vector<128x256xf32>, vector<8x256xf32> -> vector<8x256xf32>
    %179 = vector.extract_strided_slice %178 {offsets = [0, 0], sizes = [8, 128], strides = [1, 1]} : vector<8x256xf32> to vector<8x128xf32>
    %180 = vector.extract_strided_slice %6 {offsets = [4, 0], sizes = [1, 128], strides = [1, 1]} : vector<24x128xf32> to vector<1x128xf32>
    %181 = vector.broadcast %180 : vector<1x128xf32> to vector<8x128xf32>
    %182 = arith.addf %179, %181 : vector<8x128xf32>
    %183 = vector.extract_strided_slice %178 {offsets = [0, 128], sizes = [8, 128], strides = [1, 1]} : vector<8x256xf32> to vector<8x128xf32>
    %184 = vector.extract_strided_slice %6 {offsets = [5, 0], sizes = [1, 128], strides = [1, 1]} : vector<24x128xf32> to vector<1x128xf32>
    %185 = vector.broadcast %184 : vector<1x128xf32> to vector<8x128xf32>
    %186 = arith.addf %183, %185 : vector<8x128xf32>
    %187 = arith.addf %139, %182 : vector<8x128xf32>
    %188 = vector.extract_strided_slice %6 {offsets = [15, 0], sizes = [1, 128], strides = [1, 1]} : vector<24x128xf32> to vector<1x128xf32>
    %189 = vector.extract_strided_slice %6 {offsets = [16, 0], sizes = [1, 128], strides = [1, 1]} : vector<24x128xf32> to vector<1x128xf32>
    %cst_60 = arith.constant dense<0.000000e+00> : vector<128xf32>
    %190 = vector.multi_reduction <add>, %187, %cst_60 [0] : vector<8x128xf32> to vector<128xf32>
    %191 = vector.shape_cast %190 : vector<128xf32> to vector<1x128xf32>
    %192 = arith.mulf %187, %187 : vector<8x128xf32>
    %cst_61 = arith.constant dense<0.000000e+00> : vector<128xf32>
    %193 = vector.multi_reduction <add>, %192, %cst_61 [0] : vector<8x128xf32> to vector<128xf32>
    %194 = vector.shape_cast %193 : vector<128xf32> to vector<1x128xf32>
    %cst_62 = arith.constant 1.250000e-01 : f32
    %195 = vector.broadcast %cst_62 : f32 to vector<1x128xf32>
    %196 = arith.mulf %191, %195 : vector<1x128xf32>
    %cst_63 = arith.constant 1.250000e-01 : f32
    %197 = vector.broadcast %cst_63 : f32 to vector<1x128xf32>
    %198 = arith.mulf %194, %197 : vector<1x128xf32>
    %199 = arith.mulf %196, %196 : vector<1x128xf32>
    %200 = arith.subf %198, %199 : vector<1x128xf32>
    %cst_64 = arith.constant 0.000000e+00 : f32
    %201 = vector.broadcast %cst_64 : f32 to vector<1x128xf32>
    %202 = arith.maximumf %200, %201 : vector<1x128xf32>
    %cst_65 = arith.constant 9.99999974E-6 : f32
    %203 = vector.broadcast %cst_65 : f32 to vector<1x128xf32>
    %204 = arith.addf %202, %203 : vector<1x128xf32>
    %205 = math.rsqrt %204 : vector<1x128xf32>
    %206 = arith.mulf %188, %205 : vector<1x128xf32>
    %207 = vector.broadcast %196 : vector<1x128xf32> to vector<8x128xf32>
    %208 = arith.subf %187, %207 : vector<8x128xf32>
    %209 = vector.broadcast %206 : vector<1x128xf32> to vector<8x128xf32>
    %210 = arith.mulf %208, %209 : vector<8x128xf32>
    %211 = vector.broadcast %189 : vector<1x128xf32> to vector<8x128xf32>
    %212 = arith.addf %210, %211 : vector<8x128xf32>
    %cst_66 = arith.constant 1.000000e+00 : f32
    %213 = vector.broadcast %cst_66 : f32 to vector<8x128xf32>
    %214 = arith.mulf %186, %213 : vector<8x128xf32>
    %215 = arith.addf %4, %214 : vector<8x128xf32>
    %c0_67 = arith.constant 0 : index
    %c0_68 = arith.constant 0 : index
    %216 = vector.load %arg13[%c0_67, %c0_68] : memref<8x128xf32, #tpu.memory_space<vmem>>, vector<8x128xf32>
    tpu.vector_store %arg13[%c0_67, %c0_68], %212 {strides = array<i32>} : memref<8x128xf32, #tpu.memory_space<vmem>>, vector<8x128xf32>,
    %c0_69 = arith.constant 0 : index
    %c0_70 = arith.constant 0 : index
    %217 = vector.load %arg14[%c0_69, %c0_70] : memref<8x128xf32, #tpu.memory_space<vmem>>, vector<8x128xf32>
    tpu.vector_store %arg14[%c0_69, %c0_70], %215 {strides = array<i32>} : memref<8x128xf32, #tpu.memory_space<vmem>>, vector<8x128xf32>,
    %c1_i32 = arith.constant 1 : i32
    %218 = arith.cmpi eq, %arg0, %c1_i32 : i32
    %219 = arith.extui %218 : i1 to i32
    %c0_i32_71 = arith.constant 0 : i32
    %220 = arith.cmpi ne, %219, %c0_i32_71 : i32
    scf.if %220 {
      %c0_72 = arith.constant 0 : index
      %c0_73 = arith.constant 0 : index
      %221 = vector.load %arg11[%c0_72, %c0_73] : memref<8x128xf32, #tpu.memory_space<vmem>>, vector<8x128xf32>
      tpu.vector_store %arg11[%c0_72, %c0_73], %212 {strides = array<i32>} : memref<8x128xf32, #tpu.memory_space<vmem>>, vector<8x128xf32>,
      %c0_74 = arith.constant 0 : index
      %c0_75 = arith.constant 0 : index
      %222 = vector.load %arg12[%c0_74, %c0_75] : memref<8x128xf32, #tpu.memory_space<vmem>>, vector<8x128xf32>
      tpu.vector_store %arg12[%c0_74, %c0_75], %215 {strides = array<i32>} : memref<8x128xf32, #tpu.memory_space<vmem>>, vector<8x128xf32>,
    } else {
    }
    return
  }
  func.func @transform_0(%arg0: i32) -> (i32, i32) {
    %c0_i32 = arith.constant 0 : i32
    %c0_i32_0 = arith.constant 0 : i32
    %c0_i32_1 = arith.constant 0 : i32
    return %c0_i32, %c0_i32_0 : i32, i32
  }
  func.func @transform_1(%arg0: i32) -> (i32, i32) {
    %c0_i32 = arith.constant 0 : i32
    %c0_i32_0 = arith.constant 0 : i32
    %c0_i32_1 = arith.constant 0 : i32
    return %c0_i32, %c0_i32_0 : i32, i32
  }
  func.func @transform_2(%arg0: i32) -> (i32, i32) {
    %c0_i32 = arith.constant 0 : i32
    %c0_i32_0 = arith.constant 0 : i32
    %c0_i32_1 = arith.constant 0 : i32
    return %c0_i32, %c0_i32_0 : i32, i32
  }
  func.func @transform_3(%arg0: i32) -> (i32, i32) {
    %c0_i32 = arith.constant 0 : i32
    %c0_i32_0 = arith.constant 0 : i32
    %c0_i32_1 = arith.constant 0 : i32
    return %c0_i32, %c0_i32_0 : i32, i32
  }
  func.func @transform_4(%arg0: i32) -> (i32, i32) {
    %c0_i32 = arith.constant 0 : i32
    %c0_i32_0 = arith.constant 0 : i32
    %c0_i32_1 = arith.constant 0 : i32
    return %c0_i32, %c0_i32_0 : i32, i32
  }
  func.func @transform_5(%arg0: i32) -> (i32, i32) {
    %c0_i32 = arith.constant 0 : i32
    %c0_i32_0 = arith.constant 0 : i32
    %c0_i32_1 = arith.constant 0 : i32
    return %c0_i32, %c0_i32_0 : i32, i32
  }
  func.func @transform_6(%arg0: i32) -> (i32, i32, i32) {
    %c0_i32 = arith.constant 0 : i32
    %c0_i32_0 = arith.constant 0 : i32
    %c0_i32_1 = arith.constant 0 : i32
    return %arg0, %c0_i32, %c0_i32_0 : i32, i32, i32
  }
  func.func @transform_7(%arg0: i32) -> (i32, i32, i32) {
    %c0_i32 = arith.constant 0 : i32
    %c0_i32_0 = arith.constant 0 : i32
    %c0_i32_1 = arith.constant 0 : i32
    return %arg0, %c0_i32, %c0_i32_0 : i32, i32, i32
  }
  func.func @transform_8(%arg0: i32) -> (i32, i32, i32) {
    %c0_i32 = arith.constant 0 : i32
    %c0_i32_0 = arith.constant 0 : i32
    %c0_i32_1 = arith.constant 0 : i32
    return %arg0, %c0_i32, %c0_i32_0 : i32, i32, i32
  }
  func.func @transform_9(%arg0: i32) -> (i32, i32, i32) {
    %c0_i32 = arith.constant 0 : i32
    %c0_i32_0 = arith.constant 0 : i32
    %c0_i32_1 = arith.constant 0 : i32
    return %arg0, %c0_i32, %c0_i32_0 : i32, i32, i32
  }
  func.func @transform_10(%arg0: i32) -> (i32, i32) {
    %c0_i32 = arith.constant 0 : i32
    %c0_i32_0 = arith.constant 0 : i32
    %c0_i32_1 = arith.constant 0 : i32
    return %c0_i32, %c0_i32_0 : i32, i32
  }
  func.func @transform_11(%arg0: i32) -> (i32, i32) {
    %c0_i32 = arith.constant 0 : i32
    %c0_i32_0 = arith.constant 0 : i32
    %c0_i32_1 = arith.constant 0 : i32
    return %c0_i32, %c0_i32_0 : i32, i32
  }
}

</mosaic_0001>

<bundles_post_ra>
// kernel: tpu_custom_call.1
= control target key start
LH: loop header
LB: loop body
LE: loop exit
PB: predicated region body
PF: predicated region fallthrough
CT: control target
= control target key end

     0   :  { %s2816_s0 = inlined_call_operand.vmem [shape: f32[8,128], index: 0, kind: input, shape index: {}]   ;;  %s2817_s1 = inlined_call_operand.vmem [shape: f32[8,128], index: 1, kind: input, shape index: {}]   ;;  %s2818_s2 = inlined_call_operand.vmem [shape: f32[8,8], index: 2, kind: input, shape index: {}]   ;;  %s2819_s3 = inlined_call_operand.vmem [shape: f32[8,16], index: 3, kind: input, shape index: {}]   ;;  %s2820_s4 = inlined_call_operand.vmem [shape: f32[8,1], index: 4, kind: input, shape index: {}]   ;;  %s2821_s5 = inlined_call_operand.vmem [shape: f32[8,1], index: 5, kind: input, shape index: {}]   ;;  %s2822_s6 = inlined_call_operand.hbm [shape: bf16[2,128,896], index: 6, kind: input, shape index: {}]   ;;  %s2823_s7 = inlined_call_operand.vmem [shape: bf16[2,128,18], index: 7, kind: input, shape index: {}]   ;;  %s2824_s8 = inlined_call_operand.vmem [shape: bf16[2,16,128], index: 8, kind: input, shape index: {}]   ;;  %s2825_s9 = inlined_call_operand.vmem [shape: f32[2,24,128], index: 9, kind: input, shape index: {}]   ;;  %s2826_s10 = inlined_call_operand.hbm [shape: f32[8,128], index: 10, kind: output, shape index: {0}]   ;;  %s2827_s11 = inlined_call_operand.hbm [shape: f32[8,128], index: 11, kind: output, shape index: {1}]  }
   0x1   :  { %2828 = sst [smem:[#allocation14_spill]] %s2822_s6 }
   0x2   :  { %17 = vsyncpa [#allocation5], 0 }
   0x3   :  { %19 = vsyncpa [#allocation5 + $0x1], 0 }
   0x4   :  { %20 = vsyncpa [#allocation6], 0 }
   0x5   :  { %21 = vsyncpa [#allocation9], 0  ;;  %s2446_s17 = smov 0   ;;  %s2448_s18 = smov 0  }
   0x6   :  { %s2450_s19 = smov 0   ;;  %s2452_s20 = smov 0  }
   0x7 LB: > { %s2465_s21 = sadd.s32 4294967295, %s2373_s20   ;;  %s2468_s22 = sadd.s32 1, %s2373_s20   ;;  %s2373_s20 = sphi %s2452_s20, %s2838_s20   ;;  %s2369_s19 = sphi %s2450_s19, %s2837_s19   ;;  %s2365_s18 = sphi %s2448_s18, %s2836_s18   ;;  %s2361_s17 = sphi %s2446_s17, %s2835_s17  }
   0x8   : > { %s157_s23 = ssub.s32 %s2373_s20, %s2468_s22  ;;  %s160_s24 = sadd.s32 1, %s2369_s19 }
   0x9   : > { %p158_p0 = scmp.eq.s32.totalorder %s157_s23, 0  ;;  %p167_p1 = scmp.ne.s32.totalorder %s2369_s19, %s2365_s18 }
   0xa   : > { %p168_p2 = scmp.eq.s32.totalorder %s2373_s20, 0  ;;  %p173_p3 = scmp.ne.s32.totalorder %s2365_s18, %s2361_s17 }
   0xb   : > { %s2478_s25 = scalar_select %p158_p0, %s2369_s19, %s160_s24  }
   0xc   : > { %p169_p4 = por %p168_p2, %p167_p1  ;;  %p174_p5 = scmp.eq.s32.totalorder %s2465_s21, 0 }
   0xd   : > { %2829 = sst [smem:[#allocation13_spill]] %s2478_s25  ;;  %p2104_p6 = scmp.lt.s32.totalorder %s2373_s20, 2 }
   0xe   : > { %p2482_p7 = por %p174_p5, %p173_p3  ;;  %s335_s27 = sand.u32 1, %s2369_s19  }
   0xf   : > { %s2086_s28 = smul.u32 448, %s335_s27  ;;  %p2488_p8 = pnand %p2104_p6, %p169_p4 }
  0x10   : > { %s2087_s29 = smul.u32 7168, %s2373_s20  ;;  %s2832_s6 = sld [smem:[#allocation14_spill]] }
  0x11   : > { %s339_s15 = scalar_lea.vmem [#allocation4], %s2086_s28  ;;  %s2500_s17 = scalar_lea.sflag [#allocation5], %s335_s27 }
  0x12   : > { %s346_s16 = sshll.u32 %s339_s15, 4  ;;  %p2251_p11 = pneg %p2488_p8  ;;  %s2497_s16 = int_to_ptr.vmem [resolvable:$true] %s346_s16 }
  0x16   : > { %s2495_s14 = scalar_lea.hbm %s2832_s6, %s2087_s29  ;;  %s2254_s12 = scalar_lea.hbm %s2832_s6, 14336 }
  0x17   : > { %s2249_s23 = scalar_lea.hbm %s2495_s14, 7168  ;;  %p2255_p0 = scmp.lt.u32.totalorder %s2495_s14, %s2832_s6 }
  0x18   : > { %p2250_p10 = scmp.ne.s32.totalorder %s2495_s14, %s2249_s23  ;;  %p2256_p1 = scmp.lt.u32.totalorder %s2254_s12, %s2249_s23 }
  0x19   : > { %p2258_p3 = scmp.lt.u32.totalorder %s2249_s23, %s2495_s14 }
  0x1a   : > { %p2252_p12 = pnand %p2251_p11, %p2250_p10  ;;  %p2257_p2 = por %p2256_p1, %p2255_p0 }
  0x1c   : > { %p2253_p13 = pneg %p2252_p12  ;;  %p2259_p4 = por %p2258_p3, %p2257_p2 }
  0x1e   : > { %p2260_p5 = pnand %p2259_p4, %p2253_p13 }
  0x20   : > { %2263 = shalt.err (!%p2260_p5)
}
  0x21   : > { %s2264_s27 = scalar_lea.vmem %s2497_s16, 7168  ;;  %s2375_s15 = smov [#allocation4]  }
  0x22   : > { %p2265_p6 = scmp.ne.s32.totalorder %s2497_s16, %s2264_s27  ;;  %s2269_s24 = sshll.u32 %s2375_s15, 4  ;;  %s2270_s24 = int_to_ptr.vmem [resolvable:$false] %s2269_s24 }
  0x23   : > { %s2271_s29 = scalar_lea.vmem %s2270_s24, 14336  ;;  %p2272_p9 = scmp.lt.s32.totalorder %s2497_s16, %s2270_s24 }
  0x24   : > { %p2267_p10 = pnand %p2265_p6, %p2251_p11  ;;  %p2273_p0 = scmp.lt.s32.totalorder %s2271_s29, %s2264_s27 }
  0x26   : > { %p2268_p12 = pneg %p2267_p10  ;;  %p2274_p1 = por %p2273_p0, %p2272_p9 }
  0x28   : > { %p2275_p2 = pnand %p2274_p1, %p2268_p12 }
  0x2a   : > { %2278 = shalt.err (!%p2275_p2)
}
  0x2b   : > { %s2376_s23 = smov 448   ;;  %s2377_s12 = smov 28  }
  0x2c   : > { %2103 = dma.hbm_to_vmem [thread:$0]  (!%p2488_p8), %s2495_s14, 7168, %s2497_s16, %s2500_s17, %s2376_s23, %s2376_s23, %s2377_s12  }
  0x2d   : > { %p378_p11 = scmp.lt.s32.totalorder %s2373_s20, 3  ;;  %p2833_p13 = scmp.ge.s32.totalorder %s2373_s20, 1 }
  0x2f   : > { %p379_p3 = pnand %p2833_p13, %p378_p11 }
  0x30   : > { %s384_s13 = sand.u32 (!%p379_p3), 1, %s2365_s18  }
  0x31   : > { %382 = sbr.rel (%p379_p3) target bundleno = 2723 (0xaa3), region = 60  ;;  %s385_s27 = scalar_lea.sflag (!%p379_p3), [#allocation5], %s384_s13 }
  0x32   : > { %s2088_s28 = smul.u32 (!%p379_p3), 448, %s384_s13 }
  0x34   : > { %s2532_s15 = scalar_lea.vmem (!%p379_p3), [#allocation4], %s2088_s28 }
  0x38   : > { %2348 = dma.done.wait (%p2482_p7), %s385_s27, 7168  }
  0x39   : > { %2350 = vsyncadd (%p2482_p7), %s385_s27, 4294960128  ;;  %p437_p9 = scmp.lt.s32.totalorder %s2465_s21, 1  ;;  %p1691_p7 = scmp.ne.s32.totalorder %s2465_s21, 0 }
  0x3a   : > { %v456_v0 = vld [vmem:[%s2816_s0] sm:$0xff] (!%p1691_p7) }
  0x3b   : > { %s438_s30 = scalar_select %p437_p9, %s2465_s21, 1 }
  0x3c   : > { %455 = sbr.rel (%p1691_p7) target bundleno = 67 (0x43), region = 68  ;;  %v458_v1 = vld [vmem:[%s2817_s1] sm:$0xff] (!%p1691_p7)  ;;  %457 = vst [vmem:[#allocation2] sm:$0xff] (!%p1691_p7), %v456_v0 }
  0x3d   : > { %s1701_s14 = sshll.u32 %s438_s30, 6  ;;  %s1702_s20 = sshll.u32 %s438_s30, 3  ;;  %459 = vst [vmem:[#allocation3] sm:$0xff] (!%p1691_p7), %v458_v1 }
  0x3e   : > { %s2543_s24 = scalar_lea.vmem %s2823_s7, %s1701_s14  ;;  %s2548_s12 = scalar_lea.vmem %s2824_s8, %s1702_s20 }
  0x3f   : > { %s2089_s13 = smul.u32 24, %s438_s30 }
  0x41   : > { %s2553_s27 = scalar_lea.vmem %s2825_s9, %s2089_s13 }
  0x43 PF: > { %v2153_v2 = vld [vmem:[%s2532_s15 + $0x4] ss:$28 sps:$4 sm:$0xff]   ;;  %v2155_v3 = vld [vmem:[%s2532_s15 + $0xc] ss:$28 sps:$4 sm:$0xff]   ;;  %v2378_v4 = vmov 0.0   ;;  %v2596_v35 = vld [vmem:[#allocation2] sm:$0xff]  ;;  %v703_v37 = vlaneseq }
  0x44   : > { %625 = vmatprep.mubr.f32.mxu0 %v2378_v4  ;;  %696 = vmatprep.mubr.f32.mxu1 %v2378_v4  ;;  %v2157_v5 = vld [vmem:[%s2532_s15] ss:$28 sps:$4 sm:$0xff]   ;;  %v2158_v6 = vld [vmem:[%s2532_s15 + $0x8] ss:$28 sps:$4 sm:$0xff]   ;;  %v2163_v9 = vld [vmem:[%s2532_s15 + $0x38] ss:$28 sps:$4 sm:$0xff]  }
  0x45   : > { %1882 = vmatprep.subr.bf16.mxu0 %v2153_v2  ;;  %1914 = vmatprep.subr.bf16.mxu1 %v2155_v3  ;;  %v2159_v7 = vld [vmem:[%s2532_s15 + $0x3c] ss:$28 sps:$4 sm:$0xff]   ;;  %v2161_v8 = vld [vmem:[%s2532_s15 + $0x44] ss:$28 sps:$4 sm:$0xff]   ;;  %v2165_v11 = vld [vmem:[%s2532_s15 + $0x74] ss:$28 sps:$4 sm:$0xff]  }
  0x46   : > { %1884 = vmatpush1.bf16.msra.mxu0 %v2157_v5  ;;  %1916 = vmatpush1.bf16.msra.mxu1 %v2158_v6  ;;  %v2164_v10 = vld [vmem:[%s2532_s15 + $0x40] ss:$28 sps:$4 sm:$0xff]   ;;  %v2169_v13 = vld [vmem:[%s2532_s15 + $0x70] ss:$28 sps:$4 sm:$0xff]   ;;  %v2170_v14 = vld [vmem:[%s2532_s15 + $0x78] ss:$28 sps:$4 sm:$0xff]  }
  0x47   : > { %1886 = vmatprep.subr.bf16.mxu0 %v2159_v7  ;;  %1918 = vmatprep.subr.bf16.mxu1 %v2161_v8  ;;  %v2167_v12 = vld [vmem:[%s2532_s15 + $0x7c] ss:$28 sps:$4 sm:$0xff]   ;;  %v2171_v15 = vld [vmem:[%s2532_s15 + $0xac] ss:$28 sps:$4 sm:$0xff]   ;;  %v2173_v16 = vld [vmem:[%s2532_s15 + $0xb4] ss:$28 sps:$4 sm:$0xff]  }
  0x48   : > { %v2175_v17 = vld [vmem:[%s2532_s15 + $0xa8] ss:$28 sps:$4 sm:$0xff]   ;;  %v2176_v18 = vld [vmem:[%s2532_s15 + $0xb0] ss:$28 sps:$4 sm:$0xff]   ;;  %v2181_v21 = vld [vmem:[%s2532_s15 + $0xe0] ss:$28 sps:$4 sm:$0xff]  }
  0x49   : > { %v2177_v19 = vld [vmem:[%s2532_s15 + $0xe4] ss:$28 sps:$4 sm:$0xff]   ;;  %v2179_v20 = vld [vmem:[%s2532_s15 + $0xec] ss:$28 sps:$4 sm:$0xff]   ;;  %v2183_v23 = vld [vmem:[%s2532_s15 + $0x11c] ss:$28 sps:$4 sm:$0xff]  }
  0x4a   : > { %1888 = vmatpush1.bf16.msra.mxu0 %v2163_v9  ;;  %1920 = vmatpush1.bf16.msra.mxu1 %v2164_v10  ;;  %v2182_v22 = vld [vmem:[%s2532_s15 + $0xe8] ss:$28 sps:$4 sm:$0xff]   ;;  %v2187_v25 = vld [vmem:[%s2532_s15 + $0x118] ss:$28 sps:$4 sm:$0xff]   ;;  %v2188_v26 = vld [vmem:[%s2532_s15 + $0x120] ss:$28 sps:$4 sm:$0xff]  }
  0x4b   : > { %1890 = vmatprep.subr.bf16.mxu0 %v2165_v11  ;;  %1922 = vmatprep.subr.bf16.mxu1 %v2167_v12  ;;  %v2185_v24 = vld [vmem:[%s2532_s15 + $0x124] ss:$28 sps:$4 sm:$0xff]   ;;  %v2189_v27 = vld [vmem:[%s2532_s15 + $0x154] ss:$28 sps:$4 sm:$0xff]   ;;  %v2191_v28 = vld [vmem:[%s2532_s15 + $0x15c] ss:$28 sps:$4 sm:$0xff]  }
  0x4c   : > { %v2193_v29 = vld [vmem:[%s2532_s15 + $0x150] ss:$28 sps:$4 sm:$0xff]   ;;  %v2194_v30 = vld [vmem:[%s2532_s15 + $0x158] ss:$28 sps:$4 sm:$0xff]   ;;  %v2199_v33 = vld [vmem:[%s2532_s15 + $0x188] ss:$28 sps:$4 sm:$0xff]  }
  0x4d   : > { %v2195_v31 = vld [vmem:[%s2532_s15 + $0x18c] ss:$28 sps:$4 sm:$0xff]   ;;  %v2197_v32 = vld [vmem:[%s2532_s15 + $0x194] ss:$28 sps:$4 sm:$0xff]   ;;  %v2601_v36 = vld [vmem:[#allocation3] sm:$0xff]  ;;  %vm2379_vm0 = vmmov 0  }
  0x4e   : > { %1892 = vmatpush1.bf16.msra.mxu0 %v2169_v13  ;;  %1924 = vmatpush1.bf16.msra.mxu1 %v2170_v14  ;;  %v2200_v34 = vld [vmem:[%s2532_s15 + $0x190] ss:$28 sps:$4 sm:$0xff]   ;;  %v2609_v38 = vshrl.u32 %v703_v37, 7  ;;  %vm869_vm1 = vcmask 64512   ;;  %v2380_v7 = vmov 0   ;;  %v2381_v11 = vmov 0.0|0.0  }
  0x4f   : > { %1894 = vmatprep.subr.bf16.mxu0 %v2171_v15  ;;  %1926 = vmatprep.subr.bf16.mxu1 %v2173_v16  ;;  %v2614_v41 = vld [vmem:[%s2553_s27] sm:$0xff]  ;;  %v1739_v13 = vld [vmem:[%s2543_s24 + $0x8] sm:$0xff]   ;;  %v1740_v14 = vld [vmem:[%s2543_s24 + $0x10] sm:$0xff]   ;;  %s2382_s17 = smov 16   ;;  %vm1121_vm2 = vcmask 15360   ;;  %vm1126_vm3 = vcmask 130048  }
  0x50   : > { %v710_v39 = vsub.s32 1, %v2609_v38  ;;  %v720_v40 = vsub.s32 6, %v2609_v38  ;;  %v2623_v48 = vsub.s32 0, %v2609_v38  ;;  %v715_v51 = vsub.s32 2, %v2609_v38  ;;  %v867_v59 = vld [vmem:[%s2818_s2] sm:$0xff]  ;;  %2151 = vset.pattern.permute.xlu1 %v2380_v7  ;;  %2152 = vset.pattern.permute.xlu0 %v2380_v7  ;;  %v1741_v15 = vld [vmem:[%s2543_s24 + $0x18] sm:$0xff]  }
  0x51   : > { %v954_v6 = vld [vmem:[%s2820_s4] sm:$0xff]  ;;  %p1694_p8 = scmp.ne.s32.totalorder %s2465_s21, 1 }
  0x52   : > { %1896 = vmatpush1.bf16.msra.mxu0 %v2175_v17  ;;  %1928 = vmatpush1.bf16.msra.mxu1 %v2176_v18  ;;  %v711_v42 = vrot.slane %v2614_v41, %v710_v39  ;;  %v721_v43 = vrot.slane %v2614_v41, %v720_v40  ;;  %v706_v53 = vrot.slane %v2614_v41, %v2623_v48  ;;  %v1704_v12 = vld [vmem:[%s2543_s24] sm:$0xff]   ;;  %v1743_v17 = vld [vmem:[%s2543_s24 + $0x28] sm:$0xff]   ;;  %v1744_v18 = vld [vmem:[%s2543_s24 + $0x30] sm:$0xff]  }
  0x53   : > { %1898 = vmatprep.subr.bf16.mxu0 %v2177_v19  ;;  %1930 = vmatprep.subr.bf16.mxu1 %v2179_v20  ;;  %v716_v54 = vrot.slane %v2614_v41, %v715_v51  ;;  %v1742_v16 = vld [vmem:[%s2543_s24 + $0x20] sm:$0xff]   ;;  %v1745_v19 = vld [vmem:[%s2543_s24 + $0x38] sm:$0xff]   ;;  %v1098_v20 = vsub.s32 7, %v2609_v38  ;;  %s2383_s24 = smov 112  }
  0x56   : > { %1900 = vmatpush1.bf16.msra.mxu0 %v2181_v21  ;;  %1932 = vmatpush1.bf16.msra.mxu1 %v2182_v22  ;;  %v1099_v21 = vrot.slane %v2614_v41, %v1098_v20 }
  0x57   : > { %1902 = vmatprep.subr.bf16.mxu0 %v2183_v23  ;;  %1934 = vmatprep.subr.bf16.mxu1 %v2185_v24 }
  0x5a   : > { %1904 = vmatpush1.bf16.msra.mxu0 %v2187_v25  ;;  %1936 = vmatpush1.bf16.msra.mxu1 %v2188_v26 }
  0x5b   : > { %1906 = vmatprep.subr.bf16.mxu0 %v2189_v27  ;;  %1938 = vmatprep.subr.bf16.mxu1 %v2191_v28 }
  0x5e   : > { %1908 = vmatpush1.bf16.msra.mxu0 %v2193_v29  ;;  %1940 = vmatpush1.bf16.msra.mxu1 %v2194_v30 }
  0x5f   : > { %1910 = vmatprep.subr.bf16.mxu0 %v2195_v31  ;;  %1942 = vmatprep.subr.bf16.mxu1 %v2197_v32 }
  0x62   : > { %1912 = vmatpush1.bf16.msra.mxu0 %v2199_v33  ;;  %1944 = vmatpush1.bf16.msra.mxu1 %v2200_v34 }
  0x63   : > { %1789 = vmatprep.subr.mxu0 %v2378_v4  ;;  %1945 = vmatprep.subr.bf16.mxu1 %v2381_v11 }
  0x65   : > { %626 = vmatmul.mubr.f32.vlgmr.msra.gmra.mrb[0].mxu0 %v2596_v35  ;;  %697 = vmatmul.mubr.f32.vlgmr.msra.gmra.mrb[0].mxu1 %v2596_v35 }
  0x66   : > { %1791 = vmatprep.mubr.msk.f32.mxu0 %vm2379_vm0, %v2378_v4  ;;  %1836 = vmatprep.mubr.msk.f32.mxu1 %vm2379_vm0, %v2378_v4 }
  0x67   : > { %1947 = vmatpush3.bf16.msra.mxu1 %v1704_v12 }
  0x68   : > { %1948 = vmatprep.subr.bf16.mxu1 %v2381_v11 }
  0x6b   : > { %1790 = vmatpush3.xpose.msra.mxu0 %v2601_v36  ;;  %1950 = vmatpush3.bf16.msra.mxu1 %v1739_v13 }
  0x6c   : > { %1794 = vmatprep.subr.mxu0 %v2378_v4  ;;  %1951 = vmatprep.subr.bf16.mxu1 %v2381_v11 }
  0x6f   : > { %1953 = vmatpush3.bf16.msra.mxu1 %v1740_v14 }
  0x70   : > { %1954 = vmatprep.subr.bf16.mxu1 %v2381_v11 }
  0x73   : > { %1956 = vmatpush3.bf16.msra.mxu1 %v1741_v15 }
  0x74   : > { %1957 = vmatprep.subr.bf16.mxu1 %v2381_v11 }
  0x77   : > { %1959 = vmatpush3.bf16.msra.mxu1 %v1742_v16 }
  0x78   : > { %1960 = vmatprep.subr.bf16.mxu1 %v2381_v11 }
  0x7b   : > { %1962 = vmatpush3.bf16.msra.mxu1 %v1743_v17  ;;  %v1736_v17 = vld [vmem:[%s2548_s12] sm:$0xff]  }
  0x7c   : > { %1963 = vmatprep.subr.bf16.mxu1 %v2381_v11 }
  0x7f   : > { %1965 = vmatpush3.bf16.msra.mxu1 %v1744_v18  ;;  %v1215_v18 = vld [vmem:[%s2821_s5] sm:$0xff] }
  0x80   : > { %1966 = vmatprep.subr.bf16.mxu1 %v2381_v11 }
  0x83   : > { %1968 = vmatpush3.bf16.msra.mxu1 %v1745_v19 }
 0x138   : > { %v627_v44 = vpop.f32.mrb[0].mxu0  ;;  %v698_v45 = vpop.f32.mrb[0].mxu1 }
 0x139   : > { %v629_v46 = vpop.f32.mrb[1].mxu0  ;;  %v700_v47 = vpop.f32.mrb[1].mxu1  ;;  %v707_v55 = vadd.f32 %v706_v53, %v627_v44  ;;  %v717_v56 = vadd.f32 %v716_v54, %v698_v45  ;;  %v2672_v53 = vld [vmem:[%s2553_s27 + $0x8] sm:$0xff] }
 0x13a   : > { %v712_v49 = vadd.f32 %v711_v42, %v629_v46  ;;  %v722_v50 = vadd.f32 %v721_v43, %v700_v47 }
 0x13c   : > { %1792 = vmatmul.mubr.f32.vlgmr.msra.gmra.mrb[2].mxu0 %v722_v50  ;;  %v863_v52 = vmul.f32 %v722_v50, %v2601_v36 }
 0x13d   : > { %1795 = vmatpush3.xpose.msra.mxu0 %v712_v49  ;;  %1796 = vmatprep.mubr.msk.f32.mxu0 %vm2379_vm0, %v2378_v4 }
 0x13e   : > { %864 = vadd.xlane.f32.xlu0 %v863_v52  ;;  %1799 = vmatprep.subr.mxu0 %v2378_v4 }
 0x144   : > { %1797 = vmatmul.mubr.f32.vlgmr.msra.gmra.mrb[2].mxu0 %v707_v55 }
 0x145   : > { %1800 = vmatpush3.msra.mxu0 %v717_v56  ;;  %1801 = vmatprep.mubr.msk.f32.mxu0 %vm2379_vm0, %v2378_v4  ;;  %v992_v56 = vrot.slane %v2672_v53, %v715_v51 }
 0x146   : > { %1969 = vmatprep.subr.bf16.mxu0 %v2381_v11 }
 0x1cb   : > { %v865_v57 = vpop.xlane.xlu0 %864 }
 0x217   : > { %v859_v58 = vpop.f32.mrb[2].mxu0 }
 0x218   : > { %v866_v60 = vsub.f32 %v859_v58, %v865_v57  ;;  %v1798_v61 = vpop.f32.mrb[3].mxu0 }
 0x21a   : > { %v868_v62 = vadd.f32 %v867_v59, %v866_v60 }
 0x21c   : > { %v870_v63 = vsel %vm869_vm1, %v868_v62, -inf }
 0x21d   : > { %871 = vmax.xlane.f32.xlu0 %v870_v63 }
 0x233   : > { %1101 = vrot.lane.b32.xlu0 %v1099_v21, %s2382_s17 }
 0x2aa   : > { %v872_v0 = vpop.xlane.xlu0 %871 }
 0x2ab   : > { %v873_v1 = vsub.f32 %v868_v62, %v872_v0 }
 0x2ad   : > { %v874_v2 = vmul.f32 1.442695, %v873_v1 }
 0x2ae   : > { %v1102_v61 = vpop.permute.xlu0 %1101 }
 0x2af   : > { %2233 = vpow2.f32 %v874_v2 }
 0x2b9   : > { %v2234_v3 = vpop.eup %2233 }
 0x2ba   : > { %v876_v5 = vsel %vm869_vm1, %v2234_v3, 0.0 }
 0x2bb   : > { %877 = vadd.xlane.f32.xlu1 %v876_v5 }
 0x2cc   : > { %957 = vperm.xlu1 %2151, %v954_v6   ;;  %v1110_v6 = vld [vmem:[%s2819_s3] sm:$0xff] }
 0x2d0   : > { %1113 = vrot.lane.b32.xlu1 %v2601_v36, %s2382_s17 }
 0x348   : > { %v878_v8 = vpop.xlane.xlu1 %877 }
 0x349   : > { %2235 = vrcp.f32 %v878_v8 }
 0x34c   : > { %v958_v22 = vpop.permute.xlu1 %957 }
 0x350   : > { %v1114_v63 = vpop.permute.xlu1 %1113 }
 0x353   : > { %v2236_v9 = vpop.eup %2235 }
 0x354   : > { %v880_v10 = vmul.f32 %v2236_v9, %v2234_v3 }
 0x356   : > { %1802 = vmatmul.mubr.msk.f32.vlgmr.msra.gmra.mrb[4].mxu0 %vm869_vm1, %v880_v10 }
 0x357   : > { %1843 = vmatprep.mubr.msk.f32.mxu0 %vm2379_vm0, %v2378_v4  ;;  %1971 = vmatpush3.bf16.msra.mxu0 %v1736_v17  ;;  %v2226_v17 = vld [vmem:[%s2532_s15 + $0x12c] ss:$28 sps:$4 sm:$0xff]  }
 0x358   : > { %1972 = vmatprep.subr.bf16.mxu0 %v2381_v11 }
 0x429   : > { %v950_v23 = vpop.f32.mrb[4].mxu0 }
 0x42a   : > { %v960_v24 = vmul.f32 %v958_v22, %v950_v23  ;;  %v1803_v25 = vpop.f32.mrb[5].mxu0  ;;  %v2201_v23 = vld [vmem:[%s2532_s15 + $0x10] ss:$28 sps:$4 sm:$0xff]  }
 0x42b   : > { %v2203_v25 = vld [vmem:[%s2532_s15 + $0x80] ss:$28 sps:$4 sm:$0xff]  }
 0x42c   : > { %v961_v26 = vadd.f32 %v960_v24, %v2596_v35  ;;  %v2202_v24 = vld [vmem:[%s2532_s15 + $0x48] ss:$28 sps:$4 sm:$0xff]  }
 0x42e   : > { %v962_v27 = vrot.slane %v961_v26, 4  ;;  %v968_v28 = vmul.f32 %v961_v26, %v961_v26 }
 0x430   : > { %v963_v29 = vadd.f32 %v962_v27, %v961_v26  ;;  %v969_v30 = vrot.slane %v968_v28, 4  ;;  %v2205_v27 = vld [vmem:[%s2532_s15 + $0xf0] ss:$28 sps:$4 sm:$0xff]  }
 0x432   : > { %v964_v31 = vrot.slane %v963_v29, 2  ;;  %v970_v32 = vadd.f32 %v969_v30, %v968_v28  ;;  %v2207_v28 = vld [vmem:[%s2532_s15 + $0x160] ss:$28 sps:$4 sm:$0xff]  }
 0x434   : > { %v965_v33 = vadd.f32 %v964_v31, %v963_v29  ;;  %v971_v34 = vrot.slane %v970_v32, 2  ;;  %v2208_v29 = vld [vmem:[%s2532_s15 + $0x198] ss:$28 sps:$4 sm:$0xff]  }
 0x436   : > { %v966_v37 = vrot.slane %v965_v33, 1  ;;  %v972_v42 = vadd.f32 %v971_v34, %v970_v32 }
 0x438   : > { %v967_v43 = vadd.f32 %v966_v37, %v965_v33  ;;  %v973_v44 = vrot.slane %v972_v42, 1 }
 0x43a   : > { %v974_v45 = vadd.f32 %v973_v44, %v972_v42  ;;  %v975_v46 = vmul.f32 0.125, %v967_v43 }
 0x43c   : > { %v976_v47 = vmul.f32 0.125, %v974_v45  ;;  %v977_v49 = vmul.f32 %v975_v46, %v975_v46  ;;  %v983_v57 = vsub.f32 %v961_v26, %v975_v46  ;;  %v2204_v26 = vld [vmem:[%s2532_s15 + $0xb8] ss:$28 sps:$4 sm:$0xff]  }
 0x43e   : > { %v978_v50 = vsub.f32 %v976_v47, %v977_v49 }
 0x440   : > { %v979_v52 = vmax.f32 %v978_v50, 0.0 }
 0x442   : > { %v980_v35 = vadd.f32 1e-05, %v979_v52 }
 0x444   : > { %2237 = vrsqrt.f32 %v980_v35 }
 0x44e   : > { %v2238_v54 = vpop.eup %2237 }
 0x44f   : > { %v982_v55 = vmul.f32 %v2238_v54, %v2672_v53 }
 0x451   : > { %v987_v58 = vrot.slane %v982_v55, %v710_v39  ;;  %v1108_v39 = vrot.slane %v2672_v53, %v2623_v48 }
 0x453   : > { %v988_v59 = vmul.f32 %v987_v58, %v983_v57 }
 0x455   : > { %v2680_v60 = vadd.f32 %v992_v56, %v988_v59 }
 0x457   : > { %1837 = vmatmul.mubr.f32.vlgmr.msra.gmra.mrb[2].mxu1 %v2680_v60 }
 0x458   : > { %1507 = vmatprep.mubr.f32.mxu1 %v2378_v4 }
 0x52a   : > { %v1092_v62 = vpop.f32.mrb[2].mxu1 }
 0x52b   : > { %v1104_v0 = vadd.f32 %v1102_v61, %v1092_v62  ;;  %v1838_v1 = vpop.f32.mrb[3].mxu1  ;;  %v1109_v5 = vadd.f32 %v1108_v39, %v1092_v62  ;;  %v1247_v61 = vsub.s32 3, %v2609_v38  ;;  %v1252_v62 = vsub.s32 4, %v2609_v38 }
 0x52d   : > { %v1116_v2 = vmul.f32 %v1114_v63, %v1104_v0  ;;  %v1111_v7 = vadd.f32 %v1110_v6, %v1109_v5  ;;  %v2209_v5 = vld [vmem:[%s2532_s15 + $0x18] ss:$28 sps:$4 sm:$0xff]  }
 0x52e   : > { %v2211_v6 = vld [vmem:[%s2532_s15 + $0x14] ss:$28 sps:$4 sm:$0xff]   ;;  %1997 = vmatprep.subr.bf16.mxu1 %v2209_v5 }
 0x52f   : > { %1118 = vrot.lane.b32.xlu1 %v1116_v2, %s2383_s24  ;;  %1999 = vmatpush1.bf16.msra.mxu1 %v2211_v6 }
 0x5a1   : > { %v1119_v51 = vpop.permute.xlu1 %1118 }
 0x5a2   : > { %v1122_v3 = vsel %vm1121_vm2, %v1119_v51, 0.0  ;;  %v1253_v51 = vrot.slane %v2672_v53, %v1252_v62 }
 0x5a3   : > { %1123 = vadd.xlane.f32.xlu1 %v1122_v3 }
 0x630   : > { %v1124_v8 = vpop.xlane.xlu1 %1123 }
 0x631   : > { %v1125_v9 = vsub.f32 %v1111_v7, %v1124_v8  ;;  %v2212_v7 = vld [vmem:[%s2532_s15 + $0x50] ss:$28 sps:$4 sm:$0xff]  }
 0x632   : > { %v2214_v8 = vld [vmem:[%s2532_s15 + $0x4c] ss:$28 sps:$4 sm:$0xff]   ;;  %2001 = vmatprep.subr.bf16.mxu1 %v2212_v7 }
 0x633   : > { %v1127_v10 = vsel %vm1126_vm3, %v1125_v9, -inf  ;;  %2003 = vmatpush1.bf16.msra.mxu1 %v2214_v8 }
 0x634   : > { %1128 = vmax.xlane.f32.xlu0 %v1127_v10  ;;  %v2217_v10 = vld [vmem:[%s2532_s15 + $0x84] ss:$28 sps:$4 sm:$0xff]  }
 0x6c1   : > { %v1129_v12 = vpop.xlane.xlu0 %1128 }
 0x6c2   : > { %v1130_v13 = vsub.f32 %v1125_v9, %v1129_v12  ;;  %v2215_v9 = vld [vmem:[%s2532_s15 + $0x88] ss:$28 sps:$4 sm:$0xff]   ;;  %v2218_v12 = vld [vmem:[%s2532_s15 + $0xc0] ss:$28 sps:$4 sm:$0xff]  }
 0x6c3   : > { %2005 = vmatprep.subr.bf16.mxu1 %v2215_v9 }
 0x6c4   : > { %v1131_v14 = vmul.f32 1.442695, %v1130_v13  ;;  %2007 = vmatpush1.bf16.msra.mxu1 %v2217_v10  ;;  %v2220_v13 = vld [vmem:[%s2532_s15 + $0xbc] ss:$28 sps:$4 sm:$0xff]  }
 0x6c5   : > { %2009 = vmatprep.subr.bf16.mxu1 %v2218_v12 }
 0x6c6   : > { %2239 = vpow2.f32 %v1131_v14  ;;  %v2221_v14 = vld [vmem:[%s2532_s15 + $0xf8] ss:$28 sps:$4 sm:$0xff]  }
 0x6c8   : > { %2011 = vmatpush1.bf16.msra.mxu1 %v2220_v13 }
 0x6c9   : > { %2013 = vmatprep.subr.bf16.mxu1 %v2221_v14 }
 0x6d0   : > { %v2240_v15 = vpop.eup %2239 }
 0x6d1   : > { %v1133_v16 = vsel %vm1126_vm3, %v2240_v15, 0.0 }
 0x6d2   : > { %1134 = vadd.xlane.f32.xlu0 %v1133_v16  ;;  %v2224_v16 = vld [vmem:[%s2532_s15 + $0x130] ss:$28 sps:$4 sm:$0xff]  }
 0x6e8   : > { %1218 = vperm.xlu0 %2152, %v1215_v18   ;;  %v2227_v18 = vld [vmem:[%s2532_s15 + $0x168] ss:$28 sps:$4 sm:$0xff]  }
 0x75f   : > { %v1135_v19 = vpop.xlane.xlu0 %1134 }
 0x760   : > { %2241 = vrcp.f32 %v1135_v19  ;;  %v2229_v19 = vld [vmem:[%s2532_s15 + $0x164] ss:$28 sps:$4 sm:$0xff]  }
 0x767   : > { %v1219_v30 = vpop.permute.xlu0 %1218 }
 0x76a   : > { %v2242_v21 = vpop.eup %2241 }
 0x76b   : > { %v1137_v22 = vmul.f32 %v2242_v21, %v2240_v15  ;;  %v2223_v15 = vld [vmem:[%s2532_s15 + $0xf4] ss:$28 sps:$4 sm:$0xff]   ;;  %v2230_v21 = vld [vmem:[%s2532_s15 + $0x1a0] ss:$28 sps:$4 sm:$0xff]  }
 0x76c   : > { %2015 = vmatpush1.bf16.msra.mxu1 %v2223_v15 }
 0x76d   : > { %1844 = vmatmul.mubr.msk.f32.vlgmr.msra.gmra.mrb[6].mxu0 %vm1126_vm3, %v1137_v22  ;;  %2017 = vmatprep.subr.bf16.mxu1 %v2224_v16  ;;  %v2232_v22 = vld [vmem:[%s2532_s15 + $0x19c] ss:$28 sps:$4 sm:$0xff]  }
 0x76e   : > { %1878 = vmatprep.mubr.msk.f32.mxu0 %vm2379_vm0, %v2378_v4  ;;  %1974 = vmatpush3.bf16.msra.mxu0 %v2201_v23  ;;  %v2206_v4 = vld [vmem:[%s2532_s15 + $0x128] ss:$28 sps:$4 sm:$0xff]   ;;  %v1290_v23 = vrot.slane %v2614_v41, %v1247_v61 }
 0x76f   : > { %1975 = vmatprep.subr.bf16.mxu0 %v2381_v11 }
 0x770   : > { %2019 = vmatpush1.bf16.msra.mxu1 %v2226_v17 }
 0x771   : > { %2021 = vmatprep.subr.bf16.mxu1 %v2227_v18 }
 0x772   : > { %1977 = vmatpush3.bf16.msra.mxu0 %v2202_v24 }
 0x773   : > { %1978 = vmatprep.subr.bf16.mxu0 %v2381_v11 }
 0x774   : > { %2023 = vmatpush1.bf16.msra.mxu1 %v2229_v19 }
 0x775   : > { %2025 = vmatprep.subr.bf16.mxu1 %v2230_v21 }
 0x776   : > { %1980 = vmatpush3.bf16.msra.mxu0 %v2203_v25 }
 0x777   : > { %1981 = vmatprep.subr.bf16.mxu0 %v2381_v11 }
 0x778   : > { %2027 = vmatpush1.bf16.msra.mxu1 %v2232_v22 }
 0x77a   : > { %1983 = vmatpush3.bf16.msra.mxu0 %v2204_v26 }
 0x77b   : > { %1984 = vmatprep.subr.bf16.mxu0 %v2381_v11 }
 0x77e   : > { %1986 = vmatpush3.bf16.msra.mxu0 %v2205_v27 }
 0x77f   : > { %1987 = vmatprep.subr.bf16.mxu0 %v2381_v11 }
 0x782   : > { %1989 = vmatpush3.bf16.msra.mxu0 %v2206_v4 }
 0x783   : > { %1990 = vmatprep.subr.bf16.mxu0 %v2381_v11 }
 0x786   : > { %1992 = vmatpush3.bf16.msra.mxu0 %v2207_v28 }
 0x787   : > { %1993 = vmatprep.subr.bf16.mxu0 %v2381_v11 }
 0x78a   : > { %1995 = vmatpush3.bf16.msra.mxu0 %v2208_v29 }
 0x840   : > { %v1211_v31 = vpop.f32.mrb[6].mxu0 }
 0x841   : > { %v1221_v32 = vmul.f32 %v1219_v30, %v1211_v31  ;;  %v1845_v33 = vpop.f32.mrb[7].mxu0 }
 0x843   : > { %v1222_v34 = vadd.f32 %v1221_v32, %v2680_v60 }
 0x845   : > { %v1223_v37 = vrot.slane %v1222_v34, 4  ;;  %v1229_v42 = vmul.f32 %v1222_v34, %v1222_v34 }
 0x847   : > { %v1224_v43 = vadd.f32 %v1223_v37, %v1222_v34  ;;  %v1230_v44 = vrot.slane %v1229_v42, 4 }
 0x849   : > { %v1225_v45 = vrot.slane %v1224_v43, 2  ;;  %v1231_v46 = vadd.f32 %v1230_v44, %v1229_v42 }
 0x84b   : > { %v1226_v47 = vadd.f32 %v1225_v45, %v1224_v43  ;;  %v1232_v49 = vrot.slane %v1231_v46, 2 }
 0x84d   : > { %v1227_v50 = vrot.slane %v1226_v47, 1  ;;  %v1233_v52 = vadd.f32 %v1232_v49, %v1231_v46 }
 0x84f   : > { %v1228_v35 = vadd.f32 %v1227_v50, %v1226_v47  ;;  %v1234_v54 = vrot.slane %v1233_v52, 1 }
 0x851   : > { %v1235_v11 = vadd.f32 %v1234_v54, %v1233_v52  ;;  %v1236_v55 = vmul.f32 0.125, %v1228_v35  ;;  %v1385_v35 = vsub.s32 5, %v2609_v38 }
 0x853   : > { %v1237_v56 = vmul.f32 0.125, %v1235_v11  ;;  %v1238_v57 = vmul.f32 %v1236_v55, %v1236_v55  ;;  %v1244_v1 = vsub.f32 %v1222_v34, %v1236_v55  ;;  %v1391_v55 = vrot.slane %v2672_v53, %v720_v40 }
 0x855   : > { %v1239_v58 = vsub.f32 %v1237_v56, %v1238_v57 }
 0x857   : > { %v1240_v59 = vmax.f32 %v1239_v58, 0.0 }
 0x859   : > { %v1241_v60 = vadd.f32 1e-05, %v1240_v59 }
 0x85b   : > { %2243 = vrsqrt.f32 %v1241_v60 }
 0x865   : > { %v2244_v63 = vpop.eup %2243 }
 0x866   : > { %v1243_v0 = vmul.f32 %v2244_v63, %v2672_v53  ;;  %v1517_v63 = vrot.slane %v2614_v41, %v1252_v62 }
 0x868   : > { %v1248_v2 = vrot.slane %v1243_v0, %v1247_v61  ;;  %v1522_v0 = vrot.slane %v2614_v41, %v1385_v35 }
 0x86a   : > { %v1249_v3 = vmul.f32 %v1248_v2, %v1244_v1 }
 0x86c   : > { %v2721_v39 = vadd.f32 %v1253_v51, %v1249_v3 }
 0x86e   : > { %1879 = vmatmul.mubr.f32.vlgmr.msra.gmra.mrb[8].mxu0 %v2721_v39 }
 0x941   : > { %v1357_v24 = vpop.f32.mrb[8].mxu0 }
 0x942   : > { %v1358_v25 = vadd.f32 %v1357_v24, %v1290_v23  ;;  %v1880_v26 = vpop.f32.mrb[9].mxu0  ;;  %v464_v24 = vld [vmem:[%s2553_s27 + $0x10] sm:$0xff] }
 0x943   : > { %v1555_v26 = vrot.slane %v464_v24, %v2623_v48 }
 0x944   : > { %v1361_v27 = vrot.slane %v1358_v25, 4  ;;  %v1367_v4 = vmul.f32 %v1358_v25, %v1358_v25 }
 0x946   : > { %v1362_v28 = vadd.f32 %v1361_v27, %v1358_v25  ;;  %v1368_v29 = vrot.slane %v1367_v4, 4 }
 0x948   : > { %v1363_v30 = vrot.slane %v1362_v28, 2  ;;  %v1369_v31 = vadd.f32 %v1368_v29, %v1367_v4 }
 0x94a   : > { %v1364_v32 = vadd.f32 %v1363_v30, %v1362_v28  ;;  %v1370_v33 = vrot.slane %v1369_v31, 2 }
 0x94c   : > { %v1365_v34 = vrot.slane %v1364_v32, 1  ;;  %v1371_v37 = vadd.f32 %v1370_v33, %v1369_v31 }
 0x94e   : > { %v1366_v42 = vadd.f32 %v1365_v34, %v1364_v32  ;;  %v1372_v43 = vrot.slane %v1371_v37, 1 }
 0x950   : > { %v1373_v44 = vadd.f32 %v1372_v43, %v1371_v37  ;;  %v1374_v45 = vmul.f32 0.125, %v1366_v42 }
 0x952   : > { %v1375_v46 = vmul.f32 0.125, %v1373_v44  ;;  %v1376_v47 = vmul.f32 %v1374_v45, %v1374_v45  ;;  %v1382_v56 = vsub.f32 %v1358_v25, %v1374_v45 }
 0x954   : > { %v1377_v49 = vsub.f32 %v1375_v46, %v1376_v47 }
 0x956   : > { %v1378_v50 = vmax.f32 %v1377_v49, 0.0 }
 0x958   : > { %v1379_v52 = vadd.f32 1e-05, %v1378_v50 }
 0x95a   : > { %2245 = vrsqrt.f32 %v1379_v52 }
 0x964   : > { %v2246_v54 = vpop.eup %2245 }
 0x965   : > { %v1381_v11 = vmul.f32 %v2246_v54, %v2672_v53 }
 0x967   : > { %v1386_v57 = vrot.slane %v1381_v11, %v1385_v35 }
 0x969   : > { %v1387_v58 = vmul.f32 %v1386_v57, %v1382_v56 }
 0x96b   : > { %v1392_v59 = vadd.f32 %v1391_v55, %v1387_v58 }
 0x96d   : > { %v1393_v60 = vmul.f32 0.01, %v1392_v59 }
 0x96f   : > { %v1394_v61 = vmax.f32 %v1392_v59, %v1393_v60 }
 0x971   : > { %1508 = vmatmul.mubr.f32.vlgmr.msra.gmra.mrb[4].mxu1 %v1394_v61 }
 0xa44   : > { %v1509_v1 = vpop.f32.mrb[4].mxu1 }
 0xa45   : > { %v1518_v2 = vadd.f32 %v1517_v63, %v1509_v1  ;;  %v1511_v51 = vpop.f32.mrb[5].mxu1 }
 0xa46   : > { %v1523_v3 = vadd.f32 %v1522_v0, %v1511_v51 }
 0xa47   : > { %v1524_v5 = vadd.f32 %v1518_v2, %v2721_v39 }
 0xa48   : > { %v1557_v40 = vadd.f32 %v1523_v3, %v2601_v36 }
 0xa49   : > { %v1525_v6 = vrot.slane %v1524_v5, 4  ;;  %v1531_v7 = vmul.f32 %v1524_v5, %v1524_v5 }
 0xa4a   : > { %1559 = vst [vmem:[#allocation3] sm:$0xff] %v1557_v40  ;;  %1565 = vst [vmem:[#allocation8] sm:$0xff] (!%p1694_p8), %v1557_v40 }
 0xa4b   : > { %v1526_v8 = vadd.f32 %v1525_v6, %v1524_v5  ;;  %v1532_v9 = vrot.slane %v1531_v7, 4 }
 0xa4d   : > { %v1527_v10 = vrot.slane %v1526_v8, 2  ;;  %v1533_v12 = vadd.f32 %v1532_v9, %v1531_v7 }
 0xa4f   : > { %v1528_v13 = vadd.f32 %v1527_v10, %v1526_v8  ;;  %v1534_v62 = vrot.slane %v1533_v12, 2 }
 0xa51   : > { %v1529_v14 = vrot.slane %v1528_v13, 1  ;;  %v1535_v41 = vadd.f32 %v1534_v62, %v1533_v12 }
 0xa53   : > { %v1530_v15 = vadd.f32 %v1529_v14, %v1528_v13  ;;  %v1536_v16 = vrot.slane %v1535_v41, 1 }
 0xa55   : > { %v1537_v17 = vadd.f32 %v1536_v16, %v1535_v41  ;;  %v1538_v18 = vmul.f32 0.125, %v1530_v15 }
 0xa57   : > { %v1539_v19 = vmul.f32 0.125, %v1537_v17  ;;  %v1540_v39 = vmul.f32 %v1538_v18, %v1538_v18  ;;  %v1546_v27 = vsub.f32 %v1524_v5, %v1538_v18 }
 0xa59   : > { %v1541_v21 = vsub.f32 %v1539_v19, %v1540_v39 }
 0xa5b   : > { %v1542_v36 = vmax.f32 %v1541_v21, 0.0 }
 0xa5d   : > { %v1543_v22 = vadd.f32 1e-05, %v1542_v36 }
 0xa5f   : > { %2247 = vrsqrt.f32 %v1543_v22 }
 0xa69   : > { %v2248_v23 = vpop.eup %2247 }
 0xa6a   : > { %v1545_v25 = vmul.f32 %v2248_v23, %v2672_v53 }
 0xa6c   : > { %v1550_v4 = vrot.slane %v1545_v25, %v1098_v20  ;;  %1563 = sbr.rel (%p1694_p8) target bundleno = 2675 (0xa73), region = 72 }
 0xa6e   : > { %v1551_v28 = vmul.f32 %v1550_v4, %v1546_v27 }
 0xa70   : > { %v1556_v29 = vadd.f32 %v1555_v26, %v1551_v28 }
 0xa72   : > { %1558 = vst [vmem:[#allocation2] sm:$0xff] %v1556_v29  ;;  %1564 = vst [vmem:[#allocation7] sm:$0xff] (!%p1694_p8), %v1556_v29 }
 0xa73 PF: > { %p2105_p4 = scmp.eq.s32.totalorder %s2465_s21, 1  ;;  %s2384_s15 = smov [#allocation7]  }
 0xa74   : > { %s1573_s12 = sshll.u32 %s2384_s15, 4  ;;  %s2385_s26 = smov [#allocation8]   ;;  %s1574_s12 = int_to_ptr.vmem [resolvable:$true] %s1573_s12 }
 0xa75   : > { %s1584_s27 = sshll.u32 %s2385_s26, 4  ;;  %s2279_s14 = scalar_lea.vmem %s1574_s12, 128  ;;  %s1585_s27 = int_to_ptr.vmem [resolvable:$true] %s1584_s27 }
 0xa76   : > { %p2280_p5 = scmp.ne.s32.totalorder %s1574_s12, %s2279_s14  ;;  %p2286_p12 = scmp.lt.s32.totalorder %s1574_s12, %s1574_s12 }
 0xa77   : > { %p2287_p0 = scmp.lt.s32.totalorder %s2279_s14, %s2279_s14 }
 0xa78   : > { %p2281_p6 = pnand %p2280_p5, %p2105_p4 }
 0xa79   : > { %p2288_p1 = por %p2287_p0, %p2286_p12 }
 0xa7a   : > { %p2282_p10 = pneg %p2281_p6 }
 0xa7c   : > { %p2289_p2 = pnand %p2288_p1, %p2282_p10 }
 0xa7e   : > { %2292 = shalt.err (!%p2289_p2)
}
 0xa7f   : > { %s2293_s25 = scalar_lea.hbm %s2826_s10, 128 }
 0xa80   : > { %p2294_p11 = scmp.ne.s32.totalorder %s2826_s10, %s2293_s25  ;;  %p2299_p9 = scmp.lt.u32.totalorder %s2293_s25, %s2826_s10 }
 0xa82   : > { %p2295_p13 = pnand %p2294_p11, %p2105_p4 }
 0xa84   : > { %p2296_p3 = pneg %p2295_p13 }
 0xa86   : > { %p2301_p7 = pnand %p2299_p9, %p2296_p3 }
 0xa88   : > { %2304 = shalt.err (!%p2301_p7)
}
 0xa89   : > { %2093 = dma.vmem_to_hbm [thread:$0]  (%p2105_p4), %s1574_s12, 128, %s2826_s10, [#allocation6]  }
 0xa8a   : > { %s2305_s13 = scalar_lea.vmem %s1585_s27, 128  ;;  %p2312_p10 = scmp.lt.s32.totalorder %s1585_s27, %s1585_s27 }
 0xa8b   : > { %p2306_p8 = scmp.ne.s32.totalorder %s1585_s27, %s2305_s13  ;;  %p2313_p12 = scmp.lt.s32.totalorder %s2305_s13, %s2305_s13 }
 0xa8d   : > { %p2307_p5 = pnand %p2306_p8, %p2105_p4  ;;  %p2314_p0 = por %p2313_p12, %p2312_p10 }
 0xa8f   : > { %p2308_p6 = pneg %p2307_p5 }
 0xa91   : > { %p2315_p1 = pnand %p2314_p0, %p2308_p6 }
 0xa93   : > { %2318 = shalt.err (!%p2315_p1)
}
 0xa94   : > { %s2319_s26 = scalar_lea.hbm %s2827_s11, 128 }
 0xa95   : > { %p2320_p2 = scmp.ne.s32.totalorder %s2827_s11, %s2319_s26  ;;  %p2325_p3 = scmp.lt.u32.totalorder %s2319_s26, %s2827_s11 }
 0xa97   : > { %p2321_p11 = pnand %p2320_p2, %p2105_p4 }
 0xa99   : > { %p2322_p13 = pneg %p2321_p11 }
 0xa9b   : > { %p2327_p9 = pnand %p2325_p3, %p2322_p13 }
 0xa9d   : > { %2330 = shalt.err (!%p2327_p9)
}
 0xa9e   : > { %2095 = dma.vmem_to_hbm [thread:$0]  (%p2105_p4), %s1585_s27, 128, %s2827_s11, [#allocation9]  }
 0xa9f   : > { %2352 = dma.done.wait (%p2105_p4), [#allocation6], 128  }
 0xaa0   : > { %2354 = vsyncadd (%p2105_p4), [#allocation6], 4294967168 }
 0xaa1   : > { %2356 = dma.done.wait (%p2105_p4), [#allocation9], 128  }
 0xaa2   : > { %2358 = vsyncadd (%p2105_p4), [#allocation9], 4294967168 }
 0xaa3 PF: > { %s2834_s20 = sld [smem:[#allocation13_spill]]  ;;  %p24_p7 = scmp.ge.s32.totalorder %s2468_s22, 4  }
 0xaa4   : > { %s2835_s17 = smov %s2365_s18  ;;  %s2836_s18 = smov %s2369_s19 }
 0xaa5   :  { %26 = sbr.rel (!%p24_p7) target bundleno = 7 (0x7), region = 122 }
 0xaa9   : > { %s2837_s19 = smov %s2834_s20  ;;  %s2838_s20 = smov %s2468_s22 }
 0xaac   :  { %1601 = vsyncpa [#allocation5], 1 }
 0xaad   :  { %1603 = vsyncpa [#allocation5 + $0x1], 1 }
 0xaae   :  { %1604 = vsyncpa [#allocation6], 1 }
 0xaaf   :  { %1606 = vsyncpa [#allocation6 + $0x1], 1 }
 0xab0   :  { %1607 = vsyncpa [#allocation9], 1 }

</bundles_post_ra>
